<compile_context>
chip_gen: v6e
topology: v6e:2x2x1
jax: 0.10.0
libtpu: 0.0.40
codegen_flags: <defaults>
</compile_context>

<pallas_src>
import jax
import jax.numpy as jnp
from jax import lax
from jax.experimental import pallas as pl
from jax.experimental.pallas import tpu as pltpu

_BC = 8  # batch-chunk size = one sublane tile (f32)


# ----------------------------------------------------------------------------
# Helpers
# ----------------------------------------------------------------------------
def _round_up(n, m):
    return ((n + m - 1) // m) * m


def _pad2d(a, rows, cols):
    a = a.astype(jnp.float32)
    return jnp.zeros((rows, cols), jnp.float32).at[: a.shape[0], : a.shape[1]].set(a)


# ----------------------------------------------------------------------------
# Fused kernel: n_layers Elman RNN layers (wavefront-interleaved) + FC head.
# One grid step == one batch chunk of 8 rows (independent work -> "parallel").
# ----------------------------------------------------------------------------
def _build_fused_kernel(n_layers, seq_len):
    L, T, BC = n_layers, seq_len, _BC

    def kernel(*refs):
        # refs: x, [wih, whh, bias] * L, wfc, bfc, out, hid, hseq_scratch
        x_ref = refs[0]
        layer_refs = [tuple(refs[1 + 3 * l: 4 + 3 * l]) for l in range(L)]
        base = 1 + 3 * L
        wfc_ref, bfc_ref = refs[base], refs[base + 1]
        out_ref, hid_ref = refs[base + 2], refs[base + 3]
        hseq = refs[base + 4]                         # (T*BC, Hpad) scratch

        hp = layer_refs[0][1].shape[-1]               # Hpad

        wih0_ref, _, b0_ref = layer_refs[0]

        # Hoisted layer-0 input projection for ALL timesteps: one tall MXU
        # matmul, written straight into the sequence scratch (no proj_scr).
        hseq[...] = (
            jnp.dot(x_ref[0], wih0_ref[...], preferred_element_type=jnp.float32)
            + b0_ref[...]
        )

        # Per-layer biases (l >= 1): broadcast once, outside the time loop.
        bias_b = [None] * L
        for l in range(1, L):
            bias_b[l] = jnp.broadcast_to(layer_refs[l][2][...], (BC, hp))

        def _aligned(idx):
            return idx if isinstance(idx, int) else pl.multiple_of(idx, BC)

        def wave(i, hs, active):
            """One wavefront iteration: layer l handles timestep t = i - l.

            All new states are computed from the OLD carries `hs`, so the
            per-layer matmul/tanh chains are independent within an iteration.
            """
            new_hs = list(hs)
            for l in range(L):
                if not active[l]:
                    continue
                wih_ref, whh_ref, _ = layer_refs[l]
                if l == 0:
                    row = _aligned(i * BC)
                    inp = hseq[pl.ds(row, BC), :]          # precomputed proj
                else:
                    inp = (
                        jnp.dot(hs[l - 1], wih_ref[...],
                                preferred_element_type=jnp.float32)
                        + bias_b[l]
                    )
                new_hs[l] = jnp.tanh(
                    inp
                    + jnp.dot(hs[l], whh_ref[...],
                              preferred_element_type=jnp.float32)
                )
            if active[L - 1]:
                # Top layer's output feeds the FC head: overwrite hseq rows
                # strictly behind the layer-0 read front (row i - L + 1 < i).
                row_w = _aligned((i - (L - 1)) * BC)
                hseq[pl.ds(row_w, BC), :] = new_hs[L - 1]
            return new_hs

        # h0 = zeros for every layer (matches init_hidden); carried as values.
        hs = [jnp.zeros((BC, hp), jnp.float32) for _ in range(L)]

        # Prologue: wavefront indices 0 .. L-2 (only leading layers active).
        for i in range(L - 1):
            active = [(l <= i) and (i - l < T) for l in range(L)]
            hs = wave(i, hs, active)

        # Steady state: all layers active; partial unroll keeps LLO visibility
        # without exploding code size / vreg pressure for long sequences.
        steady_lo, steady_hi = L - 1, T
        if steady_hi > steady_lo:
            def body(i, hs_t):
                return tuple(wave(i, list(hs_t), [True] * L))
            unroll = min(8, steady_hi - steady_lo)
            hs = list(lax.fori_loop(steady_lo, steady_hi, body, tuple(hs),
                                    unroll=unroll))

        # Epilogue: trailing layers finish their last timesteps.
        for i in range(max(L - 1, T), T + L - 1):
            active = [(0 <= i - l < T) for l in range(L)]
            hs = wave(i, hs, active)

        # Final hidden state per layer: written once.
        for l in range(L):
            hid_ref[0, l * BC:(l + 1) * BC, :] = hs[l]

        # FC head on the whole (T*BC, Hpad) slab: one MXU matmul, lane-dense
        # (Opad multiple of 128) output store.
        out_ref[0] = (
            jnp.dot(hseq[...], wfc_ref[...], preferred_element_type=jnp.float32)
            + bfc_ref[...]
        ).astype(out_ref.dtype)

    return kernel


# ----------------------------------------------------------------------------
# Forward pass wrapper (matches the PyTorch module's forward semantics)
# ----------------------------------------------------------------------------
@jax.jit
def text_prediction_forward(params, x):
    """x: (batch, seq, input_size), batch_first — same as the PyTorch module.

    Returns (out, hidden):
      out    : (batch * seq, output_size)
      hidden : (n_layers, batch, hidden_dim)
    """
    B, T, I = x.shape
    H = params["rnn"][0]["w_hh"].shape[0]
    O = params["fc"]["w"].shape[0]
    n_layers = len(params["rnn"])

    BC = _BC
    Bp = _round_up(max(B, BC), BC)      # sublane padding
    NC = Bp // BC                       # batch chunks == grid size
    Ipad = _round_up(I, 128)            # lane padding
    Hpad = _round_up(H, 128)
    Opad = _round_up(O, 128)

    # batch_first -> time-major, pad, then group into batch chunks:
    # (NC, T*BC, Ipad) with row = t*BC + local_batch inside each chunk.
    x_tm = jnp.transpose(x, (1, 0, 2)).astype(jnp.float32)          # (T, B, I)
    x_pad = jnp.zeros((T, Bp, Ipad), jnp.float32).at[:, :B, :I].set(x_tm)
    x_ck = (x_pad.reshape(T, NC, BC, Ipad)
                 .transpose(1, 0, 2, 3)
                 .reshape(NC, T * BC, Ipad))

    # Pre-transpose / zero-pad all weights once, outside the kernel.
    inputs = [x_ck]
    for l, lp in enumerate(params["rnn"]):
        in_pad = Ipad if l == 0 else Hpad
        inputs.append(_pad2d(lp["w_ih"].T, in_pad, Hpad))            # W_ih^T
        inputs.append(_pad2d(lp["w_hh"].T, Hpad, Hpad))              # W_hh^T
        inputs.append(_pad2d((lp["b_ih"] + lp["b_hh"]).reshape(1, H), 1, Hpad))
    inputs.append(_pad2d(params["fc"]["w"].T, Hpad, Opad))           # W_fc^T
    inputs.append(_pad2d(params["fc"]["b"].reshape(1, O), 1, Opad))

    # BlockSpecs: x / out / hidden are sliced per batch chunk; weights are
    # full blocks with a constant index map (fetched once, never re-DMA'd).
    in_specs = [pl.BlockSpec((1, T * BC, Ipad), lambda c: (c, 0, 0))]
    for w in inputs[1:]:
        in_specs.append(pl.BlockSpec(w.shape, lambda c: (0, 0)))
    out_specs = (
        pl.BlockSpec((1, T * BC, Opad), lambda c: (c, 0, 0)),
        pl.BlockSpec((1, n_layers * BC, Hpad), lambda c: (c, 0, 0)),
    )

    # VMEM limit sized to the actual footprint (double-buffered blocks +
    # weights + scratch), floored at 32 MiB for compiler headroom.
    def _nbytes(shape):
        n = 4
        for s in shape:
            n *= s
        return n
    blk_bytes = (_nbytes((T * BC, Ipad)) + _nbytes((T * BC, Opad))
                 + _nbytes((n_layers * BC, Hpad)))
    w_bytes = sum(_nbytes(w.shape) for w in inputs[1:])
    scratch_bytes = _nbytes((T * BC, Hpad))
    need = 2 * (blk_bytes + w_bytes) + scratch_bytes + (4 << 20)
    vmem_limit = int(min(max(need, 32 << 20), 100 << 20))

    kernel = _build_fused_kernel(n_layers, T)

    out_ck, hid_ck = pl.pallas_call(
        kernel,
        out_shape=(
            jax.ShapeDtypeStruct((NC, T * BC, Opad), jnp.float32),
            jax.ShapeDtypeStruct((NC, n_layers * BC, Hpad), jnp.float32),
        ),
        grid_spec=pltpu.PrefetchScalarGridSpec(
            num_scalar_prefetch=0,
            grid=(NC,),
            in_specs=in_specs,
            out_specs=out_specs,
            scratch_shapes=[
                pltpu.VMEM((T * BC, Hpad), jnp.float32),   # layer-output slab
            ],
        ),
        compiler_params=pltpu.CompilerParams(
            dimension_semantics=("parallel",),
            vmem_limit_bytes=vmem_limit,
        ),
    )(*inputs)

    # Strip padding, restore batch_first order, flatten like out.reshape(-1, H).
    out_tb = (out_ck.reshape(NC, T, BC, Opad)
                    .transpose(1, 0, 2, 3)
                    .reshape(T, Bp, Opad))[:, :B, :O]                # (T, B, O)
    out = jnp.transpose(out_tb, (1, 0, 2)).reshape(B * T, O)         # (B*T, O)
    hidden = (hid_ck.reshape(NC, n_layers, BC, Hpad)
                    .transpose(1, 0, 2, 3)
                    .reshape(n_layers, Bp, Hpad))[:, :B, :H]         # (L, B, H)
    return out, hidden


# ----------------------------------------------------------------------------
# Parameter init (mirrors PyTorch's U(-1/sqrt(H), 1/sqrt(H)))
# ----------------------------------------------------------------------------
def init_params(key, input_size, output_size, hidden_dim, n_layers):
    params = {"rnn": [], "fc": {}}
    bound = 1.0 / jnp.sqrt(hidden_dim)
    keys = jax.random.split(key, 4 * n_layers + 2)
    ki = 0
    for layer in range(n_layers):
        in_dim = input_size if layer == 0 else hidden_dim
        w_ih = jax.random.uniform(keys[ki], (hidden_dim, in_dim),
                                  minval=-bound, maxval=bound); ki += 1
        w_hh = jax.random.uniform(keys[ki], (hidden_dim, hidden_dim),
                                  minval=-bound, maxval=bound); ki += 1
        b_ih = jax.random.uniform(keys[ki], (hidden_dim,),
                                  minval=-bound, maxval=bound); ki += 1
        b_hh = jax.random.uniform(keys[ki], (hidden_dim,),
                                  minval=-bound, maxval=bound); ki += 1
        params["rnn"].append(
            {"w_ih": w_ih, "w_hh": w_hh, "b_ih": b_ih, "b_hh": b_hh}
        )
    params["fc"]["w"] = jax.random.uniform(
        keys[ki], (output_size, hidden_dim), minval=-bound, maxval=bound); ki += 1
    params["fc"]["b"] = jax.random.uniform(
        keys[ki], (output_size,), minval=-bound, maxval=bound)
    return params


# ----------------------------------------------------------------------------
# Pure-JAX reference for verification
# ----------------------------------------------------------------------------
def reference_forward(params, x):
    B, T, _ = x.shape
    hidden_dim = params["rnn"][0]["w_hh"].shape[0]
    layer_in = x.astype(jnp.float32)
    h_finals = []
    for lp in params["rnn"]:
        h = jnp.zeros((B, hidden_dim), jnp.float32)
        outs = []
        for t in range(T):
            h = jnp.tanh(layer_in[:, t, :] @ lp["w_ih"].T + lp["b_ih"]
                         + h @ lp["w_hh"].T + lp["b_hh"])
            outs.append(h)
        layer_in = jnp.stack(outs, axis=1)  # (B, T, H)
        h_finals.append(h)
    hidden = jnp.stack(h_finals, axis=0)
    out2d = layer_in.reshape(B * T, hidden_dim)
    out = out2d @ params["fc"]["w"].T + params["fc"]["b"]
    return out, hidden


# ----------------------------------------------------------------------------
if __name__ == "__main__":
    batch = 2
    seq = 8
    input_size = 32     # one-hot vocabulary size
    hidden_dim = 32
    output_size = 32
    n_layers = 2

    key = jax.random.PRNGKey(0)
    pkey, xkey = jax.random.split(key)
    params = init_params(pkey, input_size, output_size, hidden_dim, n_layers)

    # One-hot "sentences": batch x seq x nbr_of_characters
    char_ids = jax.random.randint(xkey, (batch, seq), 0, input_size)
    x = jax.nn.one_hot(char_ids, input_size, dtype=jnp.float32)

    out, hidden = text_prediction_forward(params, x)
    out = jax.block_until_ready(out)
    hidden = jax.block_until_ready(hidden)

    ref_out, ref_hidden = reference_forward(params, x)

    assert out.shape == (batch * seq, output_size), out.shape
    assert hidden.shape == (n_layers, batch, hidden_dim), hidden.shape
    assert jnp.allclose(out, ref_out, atol=2e-5, rtol=2e-5)
    assert jnp.allclose(hidden, ref_hidden, atol=2e-5, rtol=2e-5)

    print("KERNEL_OK")
</pallas_src>

<mosaic_0001>
module attributes {stable_mosaic.version = 11 : i64} {
  func.func @kernel(%arg0: i32, %arg1: memref<1x64x128xf32, #tpu.memory_space<vmem>>, %arg2: memref<128x128xf32, #tpu.memory_space<vmem>>, %arg3: memref<128x128xf32, #tpu.memory_space<vmem>>, %arg4: memref<1x128xf32, #tpu.memory_space<vmem>>, %arg5: memref<128x128xf32, #tpu.memory_space<vmem>>, %arg6: memref<128x128xf32, #tpu.memory_space<vmem>>, %arg7: memref<1x128xf32, #tpu.memory_space<vmem>>, %arg8: memref<128x128xf32, #tpu.memory_space<vmem>>, %arg9: memref<1x128xf32, #tpu.memory_space<vmem>>, %arg10: memref<1x64x128xf32, #tpu.memory_space<vmem>>, %arg11: memref<1x16x128xf32, #tpu.memory_space<vmem>>, %arg12: memref<64x128xf32, #tpu.memory_space<vmem>>) attributes {dimension_semantics = [#tpu.dimension_semantics<parallel>], iteration_bounds = array<i64: 1>, scalar_prefetch = 0 : i64, scratch_operands = 1 : i64, tpu.core_type = #tpu.core_type<tc>, window_params = [{transform_indices = @transform_0, window_bounds = array<i64: 1, 64, 128>}, {pipeline_mode = #tpu.pipeline_mode<synchronous>, transform_indices = @transform_1, window_bounds = array<i64: 128, 128>}, {pipeline_mode = #tpu.pipeline_mode<synchronous>, transform_indices = @transform_2, window_bounds = array<i64: 128, 128>}, {pipeline_mode = #tpu.pipeline_mode<synchronous>, transform_indices = @transform_3, window_bounds = array<i64: 1, 128>}, {pipeline_mode = #tpu.pipeline_mode<synchronous>, transform_indices = @transform_4, window_bounds = array<i64: 128, 128>}, {pipeline_mode = #tpu.pipeline_mode<synchronous>, transform_indices = @transform_5, window_bounds = array<i64: 128, 128>}, {pipeline_mode = #tpu.pipeline_mode<synchronous>, transform_indices = @transform_6, window_bounds = array<i64: 1, 128>}, {pipeline_mode = #tpu.pipeline_mode<synchronous>, transform_indices = @transform_7, window_bounds = array<i64: 128, 128>}, {pipeline_mode = #tpu.pipeline_mode<synchronous>, transform_indices = @transform_8, window_bounds = array<i64: 1, 128>}, {transform_indices = @transform_9, window_bounds = array<i64: 1, 64, 128>}, {transform_indices = @transform_10, window_bounds = array<i64: 1, 16, 128>}]} {
    %c0 = arith.constant 0 : index
    %c0_0 = arith.constant 0 : index
    %c0_1 = arith.constant 0 : index
    %0 = vector.load %arg1[%c0, %c0_0, %c0_1] : memref<1x64x128xf32, #tpu.memory_space<vmem>>, vector<1x64x128xf32>
    %1 = vector.shape_cast %0 : vector<1x64x128xf32> to vector<64x128xf32>
    %c0_2 = arith.constant 0 : index
    %c0_3 = arith.constant 0 : index
    %2 = vector.load %arg2[%c0_2, %c0_3] : memref<128x128xf32, #tpu.memory_space<vmem>>, vector<128x128xf32>
    %cst = arith.constant dense<0.000000e+00> : vector<64x128xf32>
    %3 = tpu.matmul %1, %2, %cst {dimension_numbers = #tpu.dot_dimension_numbers<[1], [0], [0], [1], [0, 0, 1, 1], [], []>} : vector<64x128xf32>, vector<128x128xf32>, vector<64x128xf32> -> vector<64x128xf32>
    %c0_4 = arith.constant 0 : index
    %c0_5 = arith.constant 0 : index
    %4 = vector.load %arg4[%c0_4, %c0_5] : memref<1x128xf32, #tpu.memory_space<vmem>>, vector<1x128xf32>
    %5 = vector.broadcast %4 : vector<1x128xf32> to vector<64x128xf32>
    %6 = arith.addf %3, %5 : vector<64x128xf32>
    %c0_6 = arith.constant 0 : index
    %c0_7 = arith.constant 0 : index
    %7 = vector.load %arg12[%c0_6, %c0_7] : memref<64x128xf32, #tpu.memory_space<vmem>>, vector<64x128xf32>
    tpu.vector_store %arg12[%c0_6, %c0_7], %6 {strides = array<i32>} : memref<64x128xf32, #tpu.memory_space<vmem>>, vector<64x128xf32>,
    %c0_8 = arith.constant 0 : index
    %c0_9 = arith.constant 0 : index
    %8 = vector.load %arg7[%c0_8, %c0_9] : memref<1x128xf32, #tpu.memory_space<vmem>>, vector<1x128xf32>
    %9 = vector.shape_cast %8 : vector<1x128xf32> to vector<1x128xf32>
    %10 = vector.broadcast %9 : vector<1x128xf32> to vector<8x128xf32>
    %cst_10 = arith.constant 0.000000e+00 : f32
    %11 = vector.broadcast %cst_10 : f32 to vector<8x128xf32>
    %cst_11 = arith.constant 0.000000e+00 : f32
    %12 = vector.broadcast %cst_11 : f32 to vector<8x128xf32>
    %c0_12 = arith.constant 0 : index
    %c0_13 = arith.constant 0 : index
    %13 = vector.load %arg12[%c0_12, %c0_13] : memref<64x128xf32, #tpu.memory_space<vmem>>, vector<8x128xf32>
    %c0_14 = arith.constant 0 : index
    %c0_15 = arith.constant 0 : index
    %14 = vector.load %arg3[%c0_14, %c0_15] : memref<128x128xf32, #tpu.memory_space<vmem>>, vector<128x128xf32>
    %cst_16 = arith.constant dense<0.000000e+00> : vector<8x128xf32>
    %15 = tpu.matmul %11, %14, %cst_16 {dimension_numbers = #tpu.dot_dimension_numbers<[1], [0], [0], [1], [0, 0, 1, 1], [], []>} : vector<8x128xf32>, vector<128x128xf32>, vector<8x128xf32> -> vector<8x128xf32>
    %16 = arith.addf %13, %15 : vector<8x128xf32>
    %17 = math.tanh %16 : vector<8x128xf32>
    %c1_i32 = arith.constant 1 : i32
    %c8_i32 = arith.constant 8 : i32
    %18 = arith.muli %c1_i32, %c8_i32 : i32
    %19 = tpu.assume_multiple %18, 8 : i32
    %20 = arith.index_cast %19 : i32 to index
    %c0_17 = arith.constant 0 : index
    %21 = vector.load %arg12[%20, %c0_17] : memref<64x128xf32, #tpu.memory_space<vmem>>, vector<8x128xf32>
    %c0_18 = arith.constant 0 : index
    %c0_19 = arith.constant 0 : index
    %22 = vector.load %arg3[%c0_18, %c0_19] : memref<128x128xf32, #tpu.memory_space<vmem>>, vector<128x128xf32>
    %cst_20 = arith.constant dense<0.000000e+00> : vector<8x128xf32>
    %23 = tpu.matmul %17, %22, %cst_20 {dimension_numbers = #tpu.dot_dimension_numbers<[1], [0], [0], [1], [0, 0, 1, 1], [], []>} : vector<8x128xf32>, vector<128x128xf32>, vector<8x128xf32> -> vector<8x128xf32>
    %24 = arith.addf %21, %23 : vector<8x128xf32>
    %25 = math.tanh %24 : vector<8x128xf32>
    %c0_21 = arith.constant 0 : index
    %c0_22 = arith.constant 0 : index
    %26 = vector.load %arg5[%c0_21, %c0_22] : memref<128x128xf32, #tpu.memory_space<vmem>>, vector<128x128xf32>
    %cst_23 = arith.constant dense<0.000000e+00> : vector<8x128xf32>
    %27 = tpu.matmul %17, %26, %cst_23 {dimension_numbers = #tpu.dot_dimension_numbers<[1], [0], [0], [1], [0, 0, 1, 1], [], []>} : vector<8x128xf32>, vector<128x128xf32>, vector<8x128xf32> -> vector<8x128xf32>
    %28 = arith.addf %27, %10 : vector<8x128xf32>
    %c0_24 = arith.constant 0 : index
    %c0_25 = arith.constant 0 : index
    %29 = vector.load %arg6[%c0_24, %c0_25] : memref<128x128xf32, #tpu.memory_space<vmem>>, vector<128x128xf32>
    %cst_26 = arith.constant dense<0.000000e+00> : vector<8x128xf32>
    %30 = tpu.matmul %12, %29, %cst_26 {dimension_numbers = #tpu.dot_dimension_numbers<[1], [0], [0], [1], [0, 0, 1, 1], [], []>} : vector<8x128xf32>, vector<128x128xf32>, vector<8x128xf32> -> vector<8x128xf32>
    %31 = arith.addf %28, %30 : vector<8x128xf32>
    %32 = math.tanh %31 : vector<8x128xf32>
    %c1_i32_27 = arith.constant 1 : i32
    %33 = arith.subi %c1_i32, %c1_i32_27 : i32
    %c8_i32_28 = arith.constant 8 : i32
    %34 = arith.muli %33, %c8_i32_28 : i32
    %35 = tpu.assume_multiple %34, 8 : i32
    %36 = arith.index_cast %35 : i32 to index
    %c0_29 = arith.constant 0 : index
    %37 = vector.load %arg12[%36, %c0_29] : memref<64x128xf32, #tpu.memory_space<vmem>>, vector<8x128xf32>
    tpu.vector_store %arg12[%36, %c0_29], %32 {strides = array<i32>} : memref<64x128xf32, #tpu.memory_space<vmem>>, vector<8x128xf32>,
    %c2_i32 = arith.constant 2 : i32
    %c8_i32_30 = arith.constant 8 : i32
    %38 = arith.muli %c2_i32, %c8_i32_30 : i32
    %39 = tpu.assume_multiple %38, 8 : i32
    %40 = arith.index_cast %39 : i32 to index
    %c0_31 = arith.constant 0 : index
    %41 = vector.load %arg12[%40, %c0_31] : memref<64x128xf32, #tpu.memory_space<vmem>>, vector<8x128xf32>
    %c0_32 = arith.constant 0 : index
    %c0_33 = arith.constant 0 : index
    %42 = vector.load %arg3[%c0_32, %c0_33] : memref<128x128xf32, #tpu.memory_space<vmem>>, vector<128x128xf32>
    %cst_34 = arith.constant dense<0.000000e+00> : vector<8x128xf32>
    %43 = tpu.matmul %25, %42, %cst_34 {dimension_numbers = #tpu.dot_dimension_numbers<[1], [0], [0], [1], [0, 0, 1, 1], [], []>} : vector<8x128xf32>, vector<128x128xf32>, vector<8x128xf32> -> vector<8x128xf32>
    %44 = arith.addf %41, %43 : vector<8x128xf32>
    %45 = math.tanh %44 : vector<8x128xf32>
    %c0_35 = arith.constant 0 : index
    %c0_36 = arith.constant 0 : index
    %46 = vector.load %arg5[%c0_35, %c0_36] : memref<128x128xf32, #tpu.memory_space<vmem>>, vector<128x128xf32>
    %cst_37 = arith.constant dense<0.000000e+00> : vector<8x128xf32>
    %47 = tpu.matmul %25, %46, %cst_37 {dimension_numbers = #tpu.dot_dimension_numbers<[1], [0], [0], [1], [0, 0, 1, 1], [], []>} : vector<8x128xf32>, vector<128x128xf32>, vector<8x128xf32> -> vector<8x128xf32>
    %48 = arith.addf %47, %10 : vector<8x128xf32>
    %c0_38 = arith.constant 0 : index
    %c0_39 = arith.constant 0 : index
    %49 = vector.load %arg6[%c0_38, %c0_39] : memref<128x128xf32, #tpu.memory_space<vmem>>, vector<128x128xf32>
    %cst_40 = arith.constant dense<0.000000e+00> : vector<8x128xf32>
    %50 = tpu.matmul %32, %49, %cst_40 {dimension_numbers = #tpu.dot_dimension_numbers<[1], [0], [0], [1], [0, 0, 1, 1], [], []>} : vector<8x128xf32>, vector<128x128xf32>, vector<8x128xf32> -> vector<8x128xf32>
    %51 = arith.addf %48, %50 : vector<8x128xf32>
    %52 = math.tanh %51 : vector<8x128xf32>
    %c1_i32_41 = arith.constant 1 : i32
    %53 = arith.subi %c2_i32, %c1_i32_41 : i32
    %c8_i32_42 = arith.constant 8 : i32
    %54 = arith.muli %53, %c8_i32_42 : i32
    %55 = tpu.assume_multiple %54, 8 : i32
    %56 = arith.index_cast %55 : i32 to index
    %c0_43 = arith.constant 0 : index
    %57 = vector.load %arg12[%56, %c0_43] : memref<64x128xf32, #tpu.memory_space<vmem>>, vector<8x128xf32>
    tpu.vector_store %arg12[%56, %c0_43], %52 {strides = array<i32>} : memref<64x128xf32, #tpu.memory_space<vmem>>, vector<8x128xf32>,
    %c3_i32 = arith.constant 3 : i32
    %c8_i32_44 = arith.constant 8 : i32
    %58 = arith.muli %c3_i32, %c8_i32_44 : i32
    %59 = tpu.assume_multiple %58, 8 : i32
    %60 = arith.index_cast %59 : i32 to index
    %c0_45 = arith.constant 0 : index
    %61 = vector.load %arg12[%60, %c0_45] : memref<64x128xf32, #tpu.memory_space<vmem>>, vector<8x128xf32>
    %c0_46 = arith.constant 0 : index
    %c0_47 = arith.constant 0 : index
    %62 = vector.load %arg3[%c0_46, %c0_47] : memref<128x128xf32, #tpu.memory_space<vmem>>, vector<128x128xf32>
    %cst_48 = arith.constant dense<0.000000e+00> : vector<8x128xf32>
    %63 = tpu.matmul %45, %62, %cst_48 {dimension_numbers = #tpu.dot_dimension_numbers<[1], [0], [0], [1], [0, 0, 1, 1], [], []>} : vector<8x128xf32>, vector<128x128xf32>, vector<8x128xf32> -> vector<8x128xf32>
    %64 = arith.addf %61, %63 : vector<8x128xf32>
    %65 = math.tanh %64 : vector<8x128xf32>
    %c0_49 = arith.constant 0 : index
    %c0_50 = arith.constant 0 : index
    %66 = vector.load %arg5[%c0_49, %c0_50] : memref<128x128xf32, #tpu.memory_space<vmem>>, vector<128x128xf32>
    %cst_51 = arith.constant dense<0.000000e+00> : vector<8x128xf32>
    %67 = tpu.matmul %45, %66, %cst_51 {dimension_numbers = #tpu.dot_dimension_numbers<[1], [0], [0], [1], [0, 0, 1, 1], [], []>} : vector<8x128xf32>, vector<128x128xf32>, vector<8x128xf32> -> vector<8x128xf32>
    %68 = arith.addf %67, %10 : vector<8x128xf32>
    %c0_52 = arith.constant 0 : index
    %c0_53 = arith.constant 0 : index
    %69 = vector.load %arg6[%c0_52, %c0_53] : memref<128x128xf32, #tpu.memory_space<vmem>>, vector<128x128xf32>
    %cst_54 = arith.constant dense<0.000000e+00> : vector<8x128xf32>
    %70 = tpu.matmul %52, %69, %cst_54 {dimension_numbers = #tpu.dot_dimension_numbers<[1], [0], [0], [1], [0, 0, 1, 1], [], []>} : vector<8x128xf32>, vector<128x128xf32>, vector<8x128xf32> -> vector<8x128xf32>
    %71 = arith.addf %68, %70 : vector<8x128xf32>
    %72 = math.tanh %71 : vector<8x128xf32>
    %c1_i32_55 = arith.constant 1 : i32
    %73 = arith.subi %c3_i32, %c1_i32_55 : i32
    %c8_i32_56 = arith.constant 8 : i32
    %74 = arith.muli %73, %c8_i32_56 : i32
    %75 = tpu.assume_multiple %74, 8 : i32
    %76 = arith.index_cast %75 : i32 to index
    %c0_57 = arith.constant 0 : index
    %77 = vector.load %arg12[%76, %c0_57] : memref<64x128xf32, #tpu.memory_space<vmem>>, vector<8x128xf32>
    tpu.vector_store %arg12[%76, %c0_57], %72 {strides = array<i32>} : memref<64x128xf32, #tpu.memory_space<vmem>>, vector<8x128xf32>,
    %c4_i32 = arith.constant 4 : i32
    %c8_i32_58 = arith.constant 8 : i32
    %78 = arith.muli %c4_i32, %c8_i32_58 : i32
    %79 = tpu.assume_multiple %78, 8 : i32
    %80 = arith.index_cast %79 : i32 to index
    %c0_59 = arith.constant 0 : index
    %81 = vector.load %arg12[%80, %c0_59] : memref<64x128xf32, #tpu.memory_space<vmem>>, vector<8x128xf32>
    %c0_60 = arith.constant 0 : index
    %c0_61 = arith.constant 0 : index
    %82 = vector.load %arg3[%c0_60, %c0_61] : memref<128x128xf32, #tpu.memory_space<vmem>>, vector<128x128xf32>
    %cst_62 = arith.constant dense<0.000000e+00> : vector<8x128xf32>
    %83 = tpu.matmul %65, %82, %cst_62 {dimension_numbers = #tpu.dot_dimension_numbers<[1], [0], [0], [1], [0, 0, 1, 1], [], []>} : vector<8x128xf32>, vector<128x128xf32>, vector<8x128xf32> -> vector<8x128xf32>
    %84 = arith.addf %81, %83 : vector<8x128xf32>
    %85 = math.tanh %84 : vector<8x128xf32>
    %c0_63 = arith.constant 0 : index
    %c0_64 = arith.constant 0 : index
    %86 = vector.load %arg5[%c0_63, %c0_64] : memref<128x128xf32, #tpu.memory_space<vmem>>, vector<128x128xf32>
    %cst_65 = arith.constant dense<0.000000e+00> : vector<8x128xf32>
    %87 = tpu.matmul %65, %86, %cst_65 {dimension_numbers = #tpu.dot_dimension_numbers<[1], [0], [0], [1], [0, 0, 1, 1], [], []>} : vector<8x128xf32>, vector<128x128xf32>, vector<8x128xf32> -> vector<8x128xf32>
    %88 = arith.addf %87, %10 : vector<8x128xf32>
    %c0_66 = arith.constant 0 : index
    %c0_67 = arith.constant 0 : index
    %89 = vector.load %arg6[%c0_66, %c0_67] : memref<128x128xf32, #tpu.memory_space<vmem>>, vector<128x128xf32>
    %cst_68 = arith.constant dense<0.000000e+00> : vector<8x128xf32>
    %90 = tpu.matmul %72, %89, %cst_68 {dimension_numbers = #tpu.dot_dimension_numbers<[1], [0], [0], [1], [0, 0, 1, 1], [], []>} : vector<8x128xf32>, vector<128x128xf32>, vector<8x128xf32> -> vector<8x128xf32>
    %91 = arith.addf %88, %90 : vector<8x128xf32>
    %92 = math.tanh %91 : vector<8x128xf32>
    %c1_i32_69 = arith.constant 1 : i32
    %93 = arith.subi %c4_i32, %c1_i32_69 : i32
    %c8_i32_70 = arith.constant 8 : i32
    %94 = arith.muli %93, %c8_i32_70 : i32
    %95 = tpu.assume_multiple %94, 8 : i32
    %96 = arith.index_cast %95 : i32 to index
    %c0_71 = arith.constant 0 : index
    %97 = vector.load %arg12[%96, %c0_71] : memref<64x128xf32, #tpu.memory_space<vmem>>, vector<8x128xf32>
    tpu.vector_store %arg12[%96, %c0_71], %92 {strides = array<i32>} : memref<64x128xf32, #tpu.memory_space<vmem>>, vector<8x128xf32>,
    %c5_i32 = arith.constant 5 : i32
    %c8_i32_72 = arith.constant 8 : i32
    %98 = arith.muli %c5_i32, %c8_i32_72 : i32
    %99 = tpu.assume_multiple %98, 8 : i32
    %100 = arith.index_cast %99 : i32 to index
    %c0_73 = arith.constant 0 : index
    %101 = vector.load %arg12[%100, %c0_73] : memref<64x128xf32, #tpu.memory_space<vmem>>, vector<8x128xf32>
    %c0_74 = arith.constant 0 : index
    %c0_75 = arith.constant 0 : index
    %102 = vector.load %arg3[%c0_74, %c0_75] : memref<128x128xf32, #tpu.memory_space<vmem>>, vector<128x128xf32>
    %cst_76 = arith.constant dense<0.000000e+00> : vector<8x128xf32>
    %103 = tpu.matmul %85, %102, %cst_76 {dimension_numbers = #tpu.dot_dimension_numbers<[1], [0], [0], [1], [0, 0, 1, 1], [], []>} : vector<8x128xf32>, vector<128x128xf32>, vector<8x128xf32> -> vector<8x128xf32>
    %104 = arith.addf %101, %103 : vector<8x128xf32>
    %105 = math.tanh %104 : vector<8x128xf32>
    %c0_77 = arith.constant 0 : index
    %c0_78 = arith.constant 0 : index
    %106 = vector.load %arg5[%c0_77, %c0_78] : memref<128x128xf32, #tpu.memory_space<vmem>>, vector<128x128xf32>
    %cst_79 = arith.constant dense<0.000000e+00> : vector<8x128xf32>
    %107 = tpu.matmul %85, %106, %cst_79 {dimension_numbers = #tpu.dot_dimension_numbers<[1], [0], [0], [1], [0, 0, 1, 1], [], []>} : vector<8x128xf32>, vector<128x128xf32>, vector<8x128xf32> -> vector<8x128xf32>
    %108 = arith.addf %107, %10 : vector<8x128xf32>
    %c0_80 = arith.constant 0 : index
    %c0_81 = arith.constant 0 : index
    %109 = vector.load %arg6[%c0_80, %c0_81] : memref<128x128xf32, #tpu.memory_space<vmem>>, vector<128x128xf32>
    %cst_82 = arith.constant dense<0.000000e+00> : vector<8x128xf32>
    %110 = tpu.matmul %92, %109, %cst_82 {dimension_numbers = #tpu.dot_dimension_numbers<[1], [0], [0], [1], [0, 0, 1, 1], [], []>} : vector<8x128xf32>, vector<128x128xf32>, vector<8x128xf32> -> vector<8x128xf32>
    %111 = arith.addf %108, %110 : vector<8x128xf32>
    %112 = math.tanh %111 : vector<8x128xf32>
    %c1_i32_83 = arith.constant 1 : i32
    %113 = arith.subi %c5_i32, %c1_i32_83 : i32
    %c8_i32_84 = arith.constant 8 : i32
    %114 = arith.muli %113, %c8_i32_84 : i32
    %115 = tpu.assume_multiple %114, 8 : i32
    %116 = arith.index_cast %115 : i32 to index
    %c0_85 = arith.constant 0 : index
    %117 = vector.load %arg12[%116, %c0_85] : memref<64x128xf32, #tpu.memory_space<vmem>>, vector<8x128xf32>
    tpu.vector_store %arg12[%116, %c0_85], %112 {strides = array<i32>} : memref<64x128xf32, #tpu.memory_space<vmem>>, vector<8x128xf32>,
    %c6_i32 = arith.constant 6 : i32
    %c8_i32_86 = arith.constant 8 : i32
    %118 = arith.muli %c6_i32, %c8_i32_86 : i32
    %119 = tpu.assume_multiple %118, 8 : i32
    %120 = arith.index_cast %119 : i32 to index
    %c0_87 = arith.constant 0 : index
    %121 = vector.load %arg12[%120, %c0_87] : memref<64x128xf32, #tpu.memory_space<vmem>>, vector<8x128xf32>
    %c0_88 = arith.constant 0 : index
    %c0_89 = arith.constant 0 : index
    %122 = vector.load %arg3[%c0_88, %c0_89] : memref<128x128xf32, #tpu.memory_space<vmem>>, vector<128x128xf32>
    %cst_90 = arith.constant dense<0.000000e+00> : vector<8x128xf32>
    %123 = tpu.matmul %105, %122, %cst_90 {dimension_numbers = #tpu.dot_dimension_numbers<[1], [0], [0], [1], [0, 0, 1, 1], [], []>} : vector<8x128xf32>, vector<128x128xf32>, vector<8x128xf32> -> vector<8x128xf32>
    %124 = arith.addf %121, %123 : vector<8x128xf32>
    %125 = math.tanh %124 : vector<8x128xf32>
    %c0_91 = arith.constant 0 : index
    %c0_92 = arith.constant 0 : index
    %126 = vector.load %arg5[%c0_91, %c0_92] : memref<128x128xf32, #tpu.memory_space<vmem>>, vector<128x128xf32>
    %cst_93 = arith.constant dense<0.000000e+00> : vector<8x128xf32>
    %127 = tpu.matmul %105, %126, %cst_93 {dimension_numbers = #tpu.dot_dimension_numbers<[1], [0], [0], [1], [0, 0, 1, 1], [], []>} : vector<8x128xf32>, vector<128x128xf32>, vector<8x128xf32> -> vector<8x128xf32>
    %128 = arith.addf %127, %10 : vector<8x128xf32>
    %c0_94 = arith.constant 0 : index
    %c0_95 = arith.constant 0 : index
    %129 = vector.load %arg6[%c0_94, %c0_95] : memref<128x128xf32, #tpu.memory_space<vmem>>, vector<128x128xf32>
    %cst_96 = arith.constant dense<0.000000e+00> : vector<8x128xf32>
    %130 = tpu.matmul %112, %129, %cst_96 {dimension_numbers = #tpu.dot_dimension_numbers<[1], [0], [0], [1], [0, 0, 1, 1], [], []>} : vector<8x128xf32>, vector<128x128xf32>, vector<8x128xf32> -> vector<8x128xf32>
    %131 = arith.addf %128, %130 : vector<8x128xf32>
    %132 = math.tanh %131 : vector<8x128xf32>
    %c1_i32_97 = arith.constant 1 : i32
    %133 = arith.subi %c6_i32, %c1_i32_97 : i32
    %c8_i32_98 = arith.constant 8 : i32
    %134 = arith.muli %133, %c8_i32_98 : i32
    %135 = tpu.assume_multiple %134, 8 : i32
    %136 = arith.index_cast %135 : i32 to index
    %c0_99 = arith.constant 0 : index
    %137 = vector.load %arg12[%136, %c0_99] : memref<64x128xf32, #tpu.memory_space<vmem>>, vector<8x128xf32>
    tpu.vector_store %arg12[%136, %c0_99], %132 {strides = array<i32>} : memref<64x128xf32, #tpu.memory_space<vmem>>, vector<8x128xf32>,
    %c7_i32 = arith.constant 7 : i32
    %c8_i32_100 = arith.constant 8 : i32
    %138 = arith.muli %c7_i32, %c8_i32_100 : i32
    %139 = tpu.assume_multiple %138, 8 : i32
    %140 = arith.index_cast %139 : i32 to index
    %c0_101 = arith.constant 0 : index
    %141 = vector.load %arg12[%140, %c0_101] : memref<64x128xf32, #tpu.memory_space<vmem>>, vector<8x128xf32>
    %c0_102 = arith.constant 0 : index
    %c0_103 = arith.constant 0 : index
    %142 = vector.load %arg3[%c0_102, %c0_103] : memref<128x128xf32, #tpu.memory_space<vmem>>, vector<128x128xf32>
    %cst_104 = arith.constant dense<0.000000e+00> : vector<8x128xf32>
    %143 = tpu.matmul %125, %142, %cst_104 {dimension_numbers = #tpu.dot_dimension_numbers<[1], [0], [0], [1], [0, 0, 1, 1], [], []>} : vector<8x128xf32>, vector<128x128xf32>, vector<8x128xf32> -> vector<8x128xf32>
    %144 = arith.addf %141, %143 : vector<8x128xf32>
    %145 = math.tanh %144 : vector<8x128xf32>
    %c0_105 = arith.constant 0 : index
    %c0_106 = arith.constant 0 : index
    %146 = vector.load %arg5[%c0_105, %c0_106] : memref<128x128xf32, #tpu.memory_space<vmem>>, vector<128x128xf32>
    %cst_107 = arith.constant dense<0.000000e+00> : vector<8x128xf32>
    %147 = tpu.matmul %125, %146, %cst_107 {dimension_numbers = #tpu.dot_dimension_numbers<[1], [0], [0], [1], [0, 0, 1, 1], [], []>} : vector<8x128xf32>, vector<128x128xf32>, vector<8x128xf32> -> vector<8x128xf32>
    %148 = arith.addf %147, %10 : vector<8x128xf32>
    %c0_108 = arith.constant 0 : index
    %c0_109 = arith.constant 0 : index
    %149 = vector.load %arg6[%c0_108, %c0_109] : memref<128x128xf32, #tpu.memory_space<vmem>>, vector<128x128xf32>
    %cst_110 = arith.constant dense<0.000000e+00> : vector<8x128xf32>
    %150 = tpu.matmul %132, %149, %cst_110 {dimension_numbers = #tpu.dot_dimension_numbers<[1], [0], [0], [1], [0, 0, 1, 1], [], []>} : vector<8x128xf32>, vector<128x128xf32>, vector<8x128xf32> -> vector<8x128xf32>
    %151 = arith.addf %148, %150 : vector<8x128xf32>
    %152 = math.tanh %151 : vector<8x128xf32>
    %c1_i32_111 = arith.constant 1 : i32
    %153 = arith.subi %c7_i32, %c1_i32_111 : i32
    %c8_i32_112 = arith.constant 8 : i32
    %154 = arith.muli %153, %c8_i32_112 : i32
    %155 = tpu.assume_multiple %154, 8 : i32
    %156 = arith.index_cast %155 : i32 to index
    %c0_113 = arith.constant 0 : index
    %157 = vector.load %arg12[%156, %c0_113] : memref<64x128xf32, #tpu.memory_space<vmem>>, vector<8x128xf32>
    tpu.vector_store %arg12[%156, %c0_113], %152 {strides = array<i32>} : memref<64x128xf32, #tpu.memory_space<vmem>>, vector<8x128xf32>,
    %c7_i32_114 = arith.constant 7 : i32
    %c0_115 = arith.constant 0 : index
    %c0_116 = arith.constant 0 : index
    %158 = vector.load %arg5[%c0_115, %c0_116] : memref<128x128xf32, #tpu.memory_space<vmem>>, vector<128x128xf32>
    %cst_117 = arith.constant dense<0.000000e+00> : vector<8x128xf32>
    %159 = tpu.matmul %145, %158, %cst_117 {dimension_numbers = #tpu.dot_dimension_numbers<[1], [0], [0], [1], [0, 0, 1, 1], [], []>} : vector<8x128xf32>, vector<128x128xf32>, vector<8x128xf32> -> vector<8x128xf32>
    %160 = arith.addf %159, %10 : vector<8x128xf32>
    %c0_118 = arith.constant 0 : index
    %c0_119 = arith.constant 0 : index
    %161 = vector.load %arg6[%c0_118, %c0_119] : memref<128x128xf32, #tpu.memory_space<vmem>>, vector<128x128xf32>
    %cst_120 = arith.constant dense<0.000000e+00> : vector<8x128xf32>
    %162 = tpu.matmul %152, %161, %cst_120 {dimension_numbers = #tpu.dot_dimension_numbers<[1], [0], [0], [1], [0, 0, 1, 1], [], []>} : vector<8x128xf32>, vector<128x128xf32>, vector<8x128xf32> -> vector<8x128xf32>
    %163 = arith.addf %160, %162 : vector<8x128xf32>
    %164 = math.tanh %163 : vector<8x128xf32>
    %c56 = arith.constant 56 : index
    %c0_121 = arith.constant 0 : index
    %165 = vector.load %arg12[%c56, %c0_121] : memref<64x128xf32, #tpu.memory_space<vmem>>, vector<8x128xf32>
    tpu.vector_store %arg12[%c56, %c0_121], %164 {strides = array<i32>} : memref<64x128xf32, #tpu.memory_space<vmem>>, vector<8x128xf32>,
    %c0_122 = arith.constant 0 : index
    %c0_123 = arith.constant 0 : index
    %c0_124 = arith.constant 0 : index
    %166 = vector.load %arg11[%c0_122, %c0_123, %c0_124] : memref<1x16x128xf32, #tpu.memory_space<vmem>>, vector<1x8x128xf32>
    %167 = vector.shape_cast %166 : vector<1x8x128xf32> to vector<8x128xf32>
    %168 = vector.shape_cast %145 : vector<8x128xf32> to vector<1x8x128xf32>
    tpu.vector_store %arg11[%c0_122, %c0_123, %c0_124], %168 {strides = array<i32>} : memref<1x16x128xf32, #tpu.memory_space<vmem>>, vector<1x8x128xf32>,
    %c0_125 = arith.constant 0 : index
    %c8 = arith.constant 8 : index
    %c0_126 = arith.constant 0 : index
    %169 = vector.load %arg11[%c0_125, %c8, %c0_126] : memref<1x16x128xf32, #tpu.memory_space<vmem>>, vector<1x8x128xf32>
    %170 = vector.shape_cast %169 : vector<1x8x128xf32> to vector<8x128xf32>
    %171 = vector.shape_cast %164 : vector<8x128xf32> to vector<1x8x128xf32>
    tpu.vector_store %arg11[%c0_125, %c8, %c0_126], %171 {strides = array<i32>} : memref<1x16x128xf32, #tpu.memory_space<vmem>>, vector<1x8x128xf32>,
    %c0_127 = arith.constant 0 : index
    %c0_128 = arith.constant 0 : index
    %172 = vector.load %arg12[%c0_127, %c0_128] : memref<64x128xf32, #tpu.memory_space<vmem>>, vector<64x128xf32>
    %c0_129 = arith.constant 0 : index
    %c0_130 = arith.constant 0 : index
    %173 = vector.load %arg8[%c0_129, %c0_130] : memref<128x128xf32, #tpu.memory_space<vmem>>, vector<128x128xf32>
    %cst_131 = arith.constant dense<0.000000e+00> : vector<64x128xf32>
    %174 = tpu.matmul %172, %173, %cst_131 {dimension_numbers = #tpu.dot_dimension_numbers<[1], [0], [0], [1], [0, 0, 1, 1], [], []>} : vector<64x128xf32>, vector<128x128xf32>, vector<64x128xf32> -> vector<64x128xf32>
    %c0_132 = arith.constant 0 : index
    %c0_133 = arith.constant 0 : index
    %175 = vector.load %arg9[%c0_132, %c0_133] : memref<1x128xf32, #tpu.memory_space<vmem>>, vector<1x128xf32>
    %176 = vector.broadcast %175 : vector<1x128xf32> to vector<64x128xf32>
    %177 = arith.addf %174, %176 : vector<64x128xf32>
    %c0_134 = arith.constant 0 : index
    %c0_135 = arith.constant 0 : index
    %c0_136 = arith.constant 0 : index
    %178 = vector.load %arg10[%c0_134, %c0_135, %c0_136] : memref<1x64x128xf32, #tpu.memory_space<vmem>>, vector<1x64x128xf32>
    %179 = vector.shape_cast %178 : vector<1x64x128xf32> to vector<64x128xf32>
    %180 = vector.shape_cast %177 : vector<64x128xf32> to vector<1x64x128xf32>
    tpu.vector_store %arg10[%c0_134, %c0_135, %c0_136], %180 {strides = array<i32>} : memref<1x64x128xf32, #tpu.memory_space<vmem>>, vector<1x64x128xf32>,
    return
  }
  func.func @transform_0(%arg0: i32) -> (i32, i32, i32) {
    %c0_i32 = arith.constant 0 : i32
    %c0_i32_0 = arith.constant 0 : i32
    %c0_i32_1 = arith.constant 0 : i32
    return %arg0, %c0_i32, %c0_i32_0 : i32, i32, i32
  }
  func.func @transform_1(%arg0: i32) -> (i32, i32) {
    %c0_i32 = arith.constant 0 : i32
    %c0_i32_0 = arith.constant 0 : i32
    %c0_i32_1 = arith.constant 0 : i32
    return %c0_i32, %c0_i32_0 : i32, i32
  }
  func.func @transform_2(%arg0: i32) -> (i32, i32) {
    %c0_i32 = arith.constant 0 : i32
    %c0_i32_0 = arith.constant 0 : i32
    %c0_i32_1 = arith.constant 0 : i32
    return %c0_i32, %c0_i32_0 : i32, i32
  }
  func.func @transform_3(%arg0: i32) -> (i32, i32) {
    %c0_i32 = arith.constant 0 : i32
    %c0_i32_0 = arith.constant 0 : i32
    %c0_i32_1 = arith.constant 0 : i32
    return %c0_i32, %c0_i32_0 : i32, i32
  }
  func.func @transform_4(%arg0: i32) -> (i32, i32) {
    %c0_i32 = arith.constant 0 : i32
    %c0_i32_0 = arith.constant 0 : i32
    %c0_i32_1 = arith.constant 0 : i32
    return %c0_i32, %c0_i32_0 : i32, i32
  }
  func.func @transform_5(%arg0: i32) -> (i32, i32) {
    %c0_i32 = arith.constant 0 : i32
    %c0_i32_0 = arith.constant 0 : i32
    %c0_i32_1 = arith.constant 0 : i32
    return %c0_i32, %c0_i32_0 : i32, i32
  }
  func.func @transform_6(%arg0: i32) -> (i32, i32) {
    %c0_i32 = arith.constant 0 : i32
    %c0_i32_0 = arith.constant 0 : i32
    %c0_i32_1 = arith.constant 0 : i32
    return %c0_i32, %c0_i32_0 : i32, i32
  }
  func.func @transform_7(%arg0: i32) -> (i32, i32) {
    %c0_i32 = arith.constant 0 : i32
    %c0_i32_0 = arith.constant 0 : i32
    %c0_i32_1 = arith.constant 0 : i32
    return %c0_i32, %c0_i32_0 : i32, i32
  }
  func.func @transform_8(%arg0: i32) -> (i32, i32) {
    %c0_i32 = arith.constant 0 : i32
    %c0_i32_0 = arith.constant 0 : i32
    %c0_i32_1 = arith.constant 0 : i32
    return %c0_i32, %c0_i32_0 : i32, i32
  }
  func.func @transform_9(%arg0: i32) -> (i32, i32, i32) {
    %c0_i32 = arith.constant 0 : i32
    %c0_i32_0 = arith.constant 0 : i32
    %c0_i32_1 = arith.constant 0 : i32
    return %arg0, %c0_i32, %c0_i32_0 : i32, i32, i32
  }
  func.func @transform_10(%arg0: i32) -> (i32, i32, i32) {
    %c0_i32 = arith.constant 0 : i32
    %c0_i32_0 = arith.constant 0 : i32
    %c0_i32_1 = arith.constant 0 : i32
    return %arg0, %c0_i32, %c0_i32_0 : i32, i32, i32
  }
}

</mosaic_0001>

<bundles_post_ra>
// kernel: text_prediction_forward.1
= control target key start
LH: loop header
LB: loop body
LE: loop exit
PB: predicated region body
PF: predicated region fallthrough
CT: control target
= control target key end

     0   :  { %v3865_v2 = vmov 0.0   ;;  %vm3866_vm0 = vmmov 0   ;;  %s5454_s1 = inlined_call_operand.vmem [shape: f32[128,128], index: 1, kind: input, shape index: {}]   ;;  %s5455_s2 = inlined_call_operand.vmem [shape: f32[128,128], index: 2, kind: input, shape index: {}]   ;;  %s5456_s0 = inlined_call_operand.vmem [shape: f32[1,64,128], index: 0, kind: input, shape index: {}]   ;;  %s5457_s4 = inlined_call_operand.vmem [shape: f32[128,128], index: 4, kind: input, shape index: {}]   ;;  %s5458_s3 = inlined_call_operand.vmem [shape: f32[1,128], index: 3, kind: input, shape index: {}]   ;;  %s5459_s5 = inlined_call_operand.vmem [shape: f32[128,128], index: 5, kind: input, shape index: {}]   ;;  %s5460_s6 = inlined_call_operand.vmem [shape: f32[1,128], index: 6, kind: input, shape index: {}]   ;;  %s5461_s7 = inlined_call_operand.vmem [shape: f32[128,128], index: 7, kind: input, shape index: {}]   ;;  %s5462_s10 = inlined_call_operand.vmem [shape: f32[1,16,128], index: 10, kind: output, shape index: {1}]   ;;  %s5463_s8 = inlined_call_operand.vmem [shape: f32[1,128], index: 8, kind: input, shape index: {}]   ;;  %s5464_s9 = inlined_call_operand.vmem [shape: f32[1,64,128], index: 9, kind: output, shape index: {0}]  }
   0x1   :  { %v57_v0 = vld [vmem:[%s5454_s1 + $0x78] sm:$0xff]  ;;  %v56_v1 = vld [vmem:[%s5454_s1 + $0x70] sm:$0xff]  ;;  %2945 = vmatprep.subr.mxu1 %v3865_v2  ;;  %2977 = vmatprep.mubr.msk.f32.mxu1 %vm3866_vm0, %v3865_v2  ;;  %v55_v5 = vld [vmem:[%s5454_s1 + $0x68] sm:$0xff] }
   0x2   :  { %v3932_v3 = vld [vmem:[%s5455_s2 + $0x78] sm:$0xff]  ;;  %2901 = vmatprep.subr.mxu0 %v57_v0  ;;  %v3940_v4 = vld [vmem:[%s5455_s2 + $0x70] sm:$0xff]  ;;  %v3949_v6 = vld [vmem:[%s5455_s2 + $0x68] sm:$0xff] }
   0x3   :  { %2946 = vmatpush3.msra.mxu1 %v3932_v3  ;;  %2902 = vmatpush3.msra.mxu0 %v57_v0  ;;  %v54_v7 = vld [vmem:[%s5454_s1 + $0x60] sm:$0xff]  ;;  %v53_v9 = vld [vmem:[%s5454_s1 + $0x58] sm:$0xff]  ;;  %v52_v11 = vld [vmem:[%s5454_s1 + $0x50] sm:$0xff] }
   0x4   :  { %2947 = vmatprep.subr.mxu1 %v3865_v2  ;;  %2903 = vmatprep.subr.mxu0 %v56_v1  ;;  %v3959_v8 = vld [vmem:[%s5455_s2 + $0x60] sm:$0xff]  ;;  %v3969_v10 = vld [vmem:[%s5455_s2 + $0x58] sm:$0xff]  ;;  %v3979_v12 = vld [vmem:[%s5455_s2 + $0x50] sm:$0xff] }
   0x5   :  { %2948 = vmatpush3.msra.mxu1 %v3940_v4  ;;  %2904 = vmatpush3.msra.mxu0 %v56_v1  ;;  %v51_v13 = vld [vmem:[%s5454_s1 + $0x48] sm:$0xff]  ;;  %v50_v15 = vld [vmem:[%s5454_s1 + $0x40] sm:$0xff]  ;;  %v49_v17 = vld [vmem:[%s5454_s1 + $0x38] sm:$0xff] }
   0x6   :  { %2949 = vmatprep.subr.mxu1 %v3865_v2  ;;  %2905 = vmatprep.subr.mxu0 %v55_v5  ;;  %v3989_v14 = vld [vmem:[%s5455_s2 + $0x48] sm:$0xff]  ;;  %v3999_v16 = vld [vmem:[%s5455_s2 + $0x40] sm:$0xff]  ;;  %v4009_v18 = vld [vmem:[%s5455_s2 + $0x38] sm:$0xff] }
   0x7   :  { %2950 = vmatpush3.msra.mxu1 %v3949_v6  ;;  %2906 = vmatpush3.msra.mxu0 %v55_v5  ;;  %v48_v19 = vld [vmem:[%s5454_s1 + $0x30] sm:$0xff]  ;;  %v47_v21 = vld [vmem:[%s5454_s1 + $0x28] sm:$0xff]  ;;  %v46_v23 = vld [vmem:[%s5454_s1 + $0x20] sm:$0xff] }
   0x8   :  { %2951 = vmatprep.subr.mxu1 %v3865_v2  ;;  %2907 = vmatprep.subr.mxu0 %v54_v7  ;;  %v4019_v20 = vld [vmem:[%s5455_s2 + $0x30] sm:$0xff]  ;;  %v4029_v22 = vld [vmem:[%s5455_s2 + $0x28] sm:$0xff]  ;;  %v4039_v24 = vld [vmem:[%s5455_s2 + $0x20] sm:$0xff] }
   0x9   :  { %2952 = vmatpush3.msra.mxu1 %v3959_v8  ;;  %2908 = vmatpush3.msra.mxu0 %v54_v7  ;;  %v45_v25 = vld [vmem:[%s5454_s1 + $0x18] sm:$0xff]  ;;  %v44_v27 = vld [vmem:[%s5454_s1 + $0x10] sm:$0xff]  ;;  %v43_v29 = vld [vmem:[%s5454_s1 + $0x8] sm:$0xff] }
   0xa   :  { %2953 = vmatprep.subr.mxu1 %v3865_v2  ;;  %2909 = vmatprep.subr.mxu0 %v53_v9  ;;  %v4049_v26 = vld [vmem:[%s5455_s2 + $0x18] sm:$0xff]  ;;  %v4059_v28 = vld [vmem:[%s5455_s2 + $0x10] sm:$0xff]  ;;  %v34_v30 = vld [vmem:[%s5456_s0] sm:$0xff] }
   0xb   :  { %2954 = vmatpush3.msra.mxu1 %v3969_v10  ;;  %2910 = vmatpush3.msra.mxu0 %v53_v9  ;;  %v4073_v31 = vld [vmem:[%s5455_s2 + $0x8] sm:$0xff]  ;;  %v42_v32 = vld [vmem:[%s5454_s1] sm:$0xff]  ;;  %v4093_v35 = vld [vmem:[%s5457_s4 + $0x78] sm:$0xff] }
   0xc   :  { %2955 = vmatprep.subr.mxu1 %v3865_v2  ;;  %2911 = vmatprep.subr.mxu0 %v52_v11  ;;  %v4082_v33 = vld [vmem:[%s5455_s2] sm:$0xff]  ;;  %v35_v34 = vld [vmem:[%s5456_s0 + $0x8] sm:$0xff]  ;;  %v4101_v36 = vld [vmem:[%s5457_s4 + $0x70] sm:$0xff] }
   0xd   :  { %2956 = vmatpush3.msra.mxu1 %v3979_v12  ;;  %2912 = vmatpush3.msra.mxu0 %v52_v11  ;;  %v4110_v37 = vld [vmem:[%s5457_s4 + $0x68] sm:$0xff]  ;;  %v4119_v38 = vld [vmem:[%s5457_s4 + $0x60] sm:$0xff]  ;;  %v4128_v39 = vld [vmem:[%s5457_s4 + $0x58] sm:$0xff] }
   0xe   :  { %2957 = vmatprep.subr.mxu1 %v3865_v2  ;;  %2913 = vmatprep.subr.mxu0 %v51_v13  ;;  %v4165_v40 = vld [vmem:[%s5457_s4 + $0x50] sm:$0xff]  ;;  %v4172_v41 = vld [vmem:[%s5457_s4 + $0x48] sm:$0xff]  ;;  %v4179_v42 = vld [vmem:[%s5457_s4 + $0x40] sm:$0xff] }
   0xf   :  { %2958 = vmatpush3.msra.mxu1 %v3989_v14  ;;  %2914 = vmatpush3.msra.mxu0 %v51_v13  ;;  %v36_v43 = vld [vmem:[%s5456_s0 + $0x10] sm:$0xff]  ;;  %v4189_v44 = vld [vmem:[%s5457_s4 + $0x38] sm:$0xff]  ;;  %v38_v47 = vld [vmem:[%s5456_s0 + $0x20] sm:$0xff] }
  0x10   :  { %2959 = vmatprep.subr.mxu1 %v3865_v2  ;;  %2915 = vmatprep.subr.mxu0 %v50_v15  ;;  %v37_v45 = vld [vmem:[%s5456_s0 + $0x18] sm:$0xff]  ;;  %v4199_v46 = vld [vmem:[%s5457_s4 + $0x30] sm:$0xff]  ;;  %v4207_v48 = vld [vmem:[%s5457_s4 + $0x28] sm:$0xff] }
  0x11   :  { %2960 = vmatpush3.msra.mxu1 %v3999_v16  ;;  %2916 = vmatpush3.msra.mxu0 %v50_v15  ;;  %v39_v49 = vld [vmem:[%s5456_s0 + $0x28] sm:$0xff]  ;;  %v4217_v50 = vld [vmem:[%s5457_s4 + $0x20] sm:$0xff]  ;;  %v40_v51 = vld [vmem:[%s5456_s0 + $0x30] sm:$0xff] }
  0x12   :  { %2961 = vmatprep.subr.mxu1 %v3865_v2  ;;  %2917 = vmatprep.subr.mxu0 %v49_v17  ;;  %v4227_v52 = vld [vmem:[%s5457_s4 + $0x18] sm:$0xff]  ;;  %v4237_v54 = vld [vmem:[%s5457_s4 + $0x10] sm:$0xff]  ;;  %v4244_v55 = vld [vmem:[%s5457_s4 + $0x8] sm:$0xff] }
  0x13   :  { %2962 = vmatpush3.msra.mxu1 %v4009_v18  ;;  %2918 = vmatpush3.msra.mxu0 %v49_v17  ;;  %v41_v53 = vld [vmem:[%s5456_s0 + $0x38] sm:$0xff]  ;;  %v4253_v56 = vld [vmem:[%s5457_s4] sm:$0xff]  ;;  %v4275_v5 = vld [vmem:[%s5459_s5 + $0x70] sm:$0xff] }
  0x14   :  { %2963 = vmatprep.subr.mxu1 %v3865_v2  ;;  %2919 = vmatprep.subr.mxu0 %v48_v19  ;;  %v4264_v59 = vld [vmem:[%s5458_s3] ss:$0 sm:$0xff]  ;;  %v4270_v0 = vld [vmem:[%s5459_s5 + $0x78] sm:$0xff]  ;;  %v4284_v7 = vld [vmem:[%s5459_s5 + $0x68] sm:$0xff] }
  0x15   :  { %2964 = vmatpush3.msra.mxu1 %v4019_v20  ;;  %2920 = vmatpush3.msra.mxu0 %v48_v19  ;;  %v4293_v9 = vld [vmem:[%s5459_s5 + $0x60] sm:$0xff]  ;;  %v4302_v11 = vld [vmem:[%s5459_s5 + $0x58] sm:$0xff]  ;;  %v4311_v13 = vld [vmem:[%s5459_s5 + $0x50] sm:$0xff] }
  0x16   :  { %2965 = vmatprep.subr.mxu1 %v3865_v2  ;;  %2921 = vmatprep.subr.mxu0 %v47_v21  ;;  %v4320_v15 = vld [vmem:[%s5459_s5 + $0x48] sm:$0xff]  ;;  %v4329_v17 = vld [vmem:[%s5459_s5 + $0x40] sm:$0xff]  ;;  %v4338_v19 = vld [vmem:[%s5459_s5 + $0x38] sm:$0xff] }
  0x17   :  { %2966 = vmatpush3.msra.mxu1 %v4029_v22  ;;  %2922 = vmatpush3.msra.mxu0 %v47_v21  ;;  %v4347_v21 = vld [vmem:[%s5459_s5 + $0x30] sm:$0xff] }
  0x18   :  { %2967 = vmatprep.subr.mxu1 %v3865_v2  ;;  %2923 = vmatprep.subr.mxu0 %v46_v23 }
  0x19   :  { %2968 = vmatpush3.msra.mxu1 %v4039_v24  ;;  %2924 = vmatpush3.msra.mxu0 %v46_v23  ;;  %v4356_v23 = vld [vmem:[%s5459_s5 + $0x28] sm:$0xff] }
  0x1a   :  { %2969 = vmatprep.subr.mxu1 %v3865_v2  ;;  %2925 = vmatprep.subr.mxu0 %v45_v25 }
  0x1b   :  { %2970 = vmatpush3.msra.mxu1 %v4049_v26  ;;  %2926 = vmatpush3.msra.mxu0 %v45_v25  ;;  %v4365_v25 = vld [vmem:[%s5459_s5 + $0x20] sm:$0xff] }
  0x1c   :  { %2971 = vmatprep.subr.mxu1 %v3865_v2  ;;  %2927 = vmatprep.subr.mxu0 %v44_v27 }
  0x1d   :  { %2972 = vmatpush3.msra.mxu1 %v4059_v28  ;;  %2928 = vmatpush3.msra.mxu0 %v44_v27  ;;  %v4374_v27 = vld [vmem:[%s5459_s5 + $0x18] sm:$0xff] }
  0x1e   :  { %2973 = vmatprep.subr.mxu1 %v3865_v2  ;;  %2929 = vmatprep.subr.mxu0 %v43_v29 }
  0x1f   :  { %2933 = vmatprep.mubr.f32.mxu0 %v34_v30  ;;  %2930 = vmatpush3.msra.mxu0 %v43_v29  ;;  %v4383_v29 = vld [vmem:[%s5459_s5 + $0x10] sm:$0xff]  ;;  %v4392_v30 = vld [vmem:[%s5459_s5 + $0x8] sm:$0xff] }
  0x20   :  { %2974 = vmatpush3.msra.mxu1 %v4073_v31  ;;  %2931 = vmatprep.subr.mxu0 %v42_v32 }
  0x21   :  { %2975 = vmatprep.subr.mxu1 %v3865_v2  ;;  %2932 = vmatpush3.msra.mxu0 %v42_v32  ;;  %v4401_v32 = vld [vmem:[%s5459_s5] sm:$0xff] }
  0x22   :  { %2976 = vmatpush3.msra.mxu1 %v4082_v33  ;;  %2934 = vmatmul.mubr.f32.vlgmr.msra.gmra.mxu0 %v35_v34 }
  0x23   :  { %2978 = vmatmul.mubr.f32.vlgmr.msra.gmra.mxu1 %v3865_v2  ;;  %2980 = vmatprep.subr.mxu0 %v3865_v2 }
  0x24   :  { %3015 = vmatprep.subr.mxu1 %v3865_v2  ;;  %2981 = vmatpush3.msra.mxu0 %v3932_v3 }
  0x25   :  { %3016 = vmatpush3.msra.mxu1 %v4093_v35  ;;  %2982 = vmatprep.subr.mxu0 %v3865_v2 }
  0x26   :  { %3017 = vmatprep.subr.mxu1 %v3865_v2  ;;  %2983 = vmatpush3.msra.mxu0 %v3940_v4 }
  0x27   :  { %3018 = vmatpush3.msra.mxu1 %v4101_v36  ;;  %2984 = vmatprep.subr.mxu0 %v3865_v2 }
  0x28   :  { %3019 = vmatprep.subr.mxu1 %v3865_v2  ;;  %2985 = vmatpush3.msra.mxu0 %v3949_v6 }
  0x29   :  { %3020 = vmatpush3.msra.mxu1 %v4110_v37  ;;  %2986 = vmatprep.subr.mxu0 %v3865_v2 }
  0x2a   :  { %3021 = vmatprep.subr.mxu1 %v3865_v2  ;;  %2987 = vmatpush3.msra.mxu0 %v3959_v8 }
  0x2b   :  { %3022 = vmatpush3.msra.mxu1 %v4119_v38  ;;  %2988 = vmatprep.subr.mxu0 %v3865_v2 }
  0x2c   :  { %3023 = vmatprep.subr.mxu1 %v3865_v2  ;;  %2989 = vmatpush3.msra.mxu0 %v3969_v10 }
  0x2d   :  { %3024 = vmatpush3.msra.mxu1 %v4128_v39  ;;  %2990 = vmatprep.subr.mxu0 %v3865_v2 }
  0x2e   :  { %3025 = vmatprep.subr.mxu1 %v3865_v2  ;;  %2991 = vmatpush3.msra.mxu0 %v3979_v12 }
  0x2f   :  { %3047 = vmatprep.mubr.msk.f32.mxu1 %vm3866_vm0, %v3865_v2  ;;  %2992 = vmatprep.subr.mxu0 %v3865_v2 }
  0x30   :  { %2993 = vmatpush3.msra.mxu0 %v3989_v14  ;;  %3026 = vmatpush3.msra.mxu1 %v4165_v40 }
  0x31   :  { %2994 = vmatprep.subr.mxu0 %v3865_v2  ;;  %3027 = vmatprep.subr.mxu1 %v3865_v2 }
  0x32   :  { %2995 = vmatpush3.msra.mxu0 %v3999_v16  ;;  %3028 = vmatpush3.msra.mxu1 %v4172_v41 }
  0x33   :  { %2996 = vmatprep.subr.mxu0 %v3865_v2  ;;  %3029 = vmatprep.subr.mxu1 %v3865_v2 }
  0x34   :  { %2997 = vmatpush3.msra.mxu0 %v4009_v18  ;;  %3030 = vmatpush3.msra.mxu1 %v4179_v42 }
  0x35   :  { %2998 = vmatprep.subr.mxu0 %v3865_v2  ;;  %3031 = vmatprep.subr.mxu1 %v3865_v2 }
  0x36   :  { %2999 = vmatpush3.msra.mxu0 %v4019_v20  ;;  %2936 = vmatprep.mubr.f32.mxu0 %v36_v43 }
  0x37   :  { %3000 = vmatprep.subr.mxu0 %v3865_v2  ;;  %3032 = vmatpush3.msra.mxu1 %v4189_v44 }
  0x38   :  { %3001 = vmatpush3.msra.mxu0 %v4029_v22  ;;  %3033 = vmatprep.subr.mxu1 %v3865_v2 }
  0x39   :  { %3002 = vmatprep.subr.mxu0 %v3865_v2  ;;  %2937 = vmatmul.mubr.f32.gmra.mxu0 %v37_v45 }
  0x3a   :  { %3003 = vmatpush3.msra.mxu0 %v4039_v24  ;;  %3034 = vmatpush3.msra.mxu1 %v4199_v46 }
  0x3b   :  { %3004 = vmatprep.subr.mxu0 %v3865_v2  ;;  %2939 = vmatprep.mubr.f32.mxu0 %v38_v47 }
  0x3c   :  { %3005 = vmatpush3.msra.mxu0 %v4049_v26  ;;  %3035 = vmatprep.subr.mxu1 %v3865_v2 }
  0x3d   :  { %3006 = vmatprep.subr.mxu0 %v3865_v2  ;;  %3036 = vmatpush3.msra.mxu1 %v4207_v48 }
  0x3e   :  { %3007 = vmatpush3.msra.mxu0 %v4059_v28  ;;  %3037 = vmatprep.subr.mxu1 %v3865_v2 }
  0x3f   :  { %3008 = vmatprep.subr.mxu0 %v3865_v2  ;;  %2940 = vmatmul.mubr.f32.gmra.mxu0 %v39_v49 }
  0x40   :  { %3009 = vmatpush3.msra.mxu0 %v4073_v31  ;;  %3038 = vmatpush3.msra.mxu1 %v4217_v50 }
  0x41   :  { %3010 = vmatprep.subr.mxu0 %v3865_v2  ;;  %2942 = vmatprep.mubr.f32.mxu0 %v40_v51 }
  0x42   :  { %3011 = vmatpush3.msra.mxu0 %v4082_v33  ;;  %3039 = vmatprep.subr.mxu1 %v3865_v2 }
  0x43   :  { %3050 = vmatprep.subr.mxu0 %v3865_v2  ;;  %3040 = vmatpush3.msra.mxu1 %v4227_v52 }
  0x44   :  { %2943 = vmatmul.mubr.f32.gmra.mxu0 %v41_v53  ;;  %3041 = vmatprep.subr.mxu1 %v3865_v2 }
  0x45   :  { %3042 = vmatpush3.msra.mxu1 %v4237_v54  ;;  %3012 = vmatprep.mubr.msk.f32.mxu0 %vm3866_vm0, %v3865_v2 }
  0x46   :  { %3043 = vmatprep.subr.mxu1 %v3865_v2 }
  0x47   :  { %3044 = vmatpush3.msra.mxu1 %v4244_v55 }
  0x48   :  { %3045 = vmatprep.subr.mxu1 %v3865_v2 }
  0x49   :  { %3046 = vmatpush3.msra.mxu1 %v4253_v56 }
  0x4a   :  { %3085 = vmatprep.subr.mxu1 %v3865_v2 }
  0xe2   :  { %v4259_v57 = vpop.f32.mrf.mxu0 }
  0xe3   :  { %v268_v58 = vpop.f32.mrf.mxu1  ;;  %v137_v53 = vadd.f32 %v4259_v57, %v4264_v59  ;;  %v4606_v57 = vld [vmem:[%s5455_s2 + $0x60] sm:$0xff] }
  0xe4   :  { %v131_v60 = vpop.f32.mrf.mxu0 }
  0xe5   :  { %v2979_v61 = vpop.f32.mrf.mxu1  ;;  %v132_v62 = vadd.f32 %v4264_v59, %v131_v60 }
  0xe7   :  { %v272_v63 = vadd.f32 %v268_v58, %v132_v62 }
  0xe9   :  { %3831 = vtanh.f32 %v272_v63 }
  0xf6   :  { %v3832_v1 = vpop.eup %3831 }
  0xf7   :  { %3013 = vmatmul.mubr.f32.vlgmr.msra.gmra.mxu0 %v3832_v1  ;;  %3048 = vmatmul.mubr.f32.vlgmr.msra.gmra.mxu1 %v3832_v1 }
  0xf8   :  { %3051 = vmatpush3.msra.mxu0 %v4270_v0  ;;  %3082 = vmatprep.mubr.msk.f32.mxu0 %vm3866_vm0, %v3865_v2 }
  0xf9   :  { %3052 = vmatprep.subr.mxu0 %v3865_v2  ;;  %3086 = vmatpush3.msra.mxu1 %v3932_v3  ;;  %v4450_v34 = vpop.f32.mrf.mxu0 }
  0xfa   :  { %3053 = vmatpush3.msra.mxu0 %v4275_v5  ;;  %3087 = vmatprep.subr.mxu1 %v3865_v2 }
  0xfb   :  { %3054 = vmatprep.subr.mxu0 %v3865_v2  ;;  %3088 = vmatpush3.msra.mxu1 %v3940_v4  ;;  %v4452_v43 = vpop.f32.mrf.mxu0 }
  0xfc   :  { %3055 = vmatpush3.msra.mxu0 %v4284_v7  ;;  %3089 = vmatprep.subr.mxu1 %v3865_v2 }
  0xfd   :  { %3056 = vmatprep.subr.mxu0 %v3865_v2  ;;  %3090 = vmatpush3.msra.mxu1 %v3949_v6 }
  0xfe   :  { %3057 = vmatpush3.msra.mxu0 %v4293_v9  ;;  %3091 = vmatprep.subr.mxu1 %v3865_v2 }
  0xff   :  { %3058 = vmatprep.subr.mxu0 %v3865_v2  ;;  %3092 = vmatpush3.msra.mxu1 %v3959_v8  ;;  %v4454_v45 = vpop.f32.mrf.mxu0 }
 0x100   :  { %3059 = vmatpush3.msra.mxu0 %v4302_v11  ;;  %3093 = vmatprep.subr.mxu1 %v3865_v2 }
 0x101   :  { %3060 = vmatprep.subr.mxu0 %v3865_v2  ;;  %3094 = vmatpush3.msra.mxu1 %v3969_v10  ;;  %v4456_v47 = vpop.f32.mrf.mxu0 }
 0x102   :  { %3061 = vmatpush3.msra.mxu0 %v4311_v13  ;;  %3095 = vmatprep.subr.mxu1 %v3865_v2 }
 0x103   :  { %3062 = vmatprep.subr.mxu0 %v3865_v2  ;;  %3096 = vmatpush3.msra.mxu1 %v3979_v12 }
 0x104   :  { %3063 = vmatpush3.msra.mxu0 %v4320_v15  ;;  %3097 = vmatprep.subr.mxu1 %v3865_v2  ;;  %v4458_v49 = vpop.f32.mrf.mxu0 }
 0x105   :  { %3064 = vmatprep.subr.mxu0 %v3865_v2  ;;  %3098 = vmatpush3.msra.mxu1 %v3989_v14 }
 0x106   :  { %3065 = vmatpush3.msra.mxu0 %v4329_v17  ;;  %3099 = vmatprep.subr.mxu1 %v3865_v2  ;;  %v4460_v51 = vpop.f32.mrf.mxu0 }
 0x107   :  { %3066 = vmatprep.subr.mxu0 %v3865_v2  ;;  %3100 = vmatpush3.msra.mxu1 %v3999_v16 }
 0x108   :  { %3067 = vmatpush3.msra.mxu0 %v4338_v19  ;;  %3101 = vmatprep.subr.mxu1 %v3865_v2 }
 0x109   :  { %3068 = vmatprep.subr.mxu0 %v3865_v2  ;;  %3102 = vmatpush3.msra.mxu1 %v4009_v18 }
 0x10a   :  { %3069 = vmatpush3.msra.mxu0 %v4347_v21  ;;  %3103 = vmatprep.subr.mxu1 %v3865_v2 }
 0x10b   :  { %3070 = vmatprep.subr.mxu0 %v3865_v2  ;;  %3104 = vmatpush3.msra.mxu1 %v4019_v20 }
 0x10c   :  { %3071 = vmatpush3.msra.mxu0 %v4356_v23  ;;  %3105 = vmatprep.subr.mxu1 %v3865_v2 }
 0x10d   :  { %3072 = vmatprep.subr.mxu0 %v3865_v2  ;;  %3106 = vmatpush3.msra.mxu1 %v4029_v22 }
 0x10e   :  { %3073 = vmatpush3.msra.mxu0 %v4365_v25  ;;  %3107 = vmatprep.subr.mxu1 %v3865_v2 }
 0x10f   :  { %3074 = vmatprep.subr.mxu0 %v3865_v2  ;;  %3108 = vmatpush3.msra.mxu1 %v4039_v24 }
 0x110   :  { %3075 = vmatpush3.msra.mxu0 %v4374_v27  ;;  %3109 = vmatprep.subr.mxu1 %v3865_v2 }
 0x111   :  { %3076 = vmatprep.subr.mxu0 %v3865_v2  ;;  %3110 = vmatpush3.msra.mxu1 %v4049_v26 }
 0x112   :  { %3077 = vmatpush3.msra.mxu0 %v4383_v29  ;;  %3111 = vmatprep.subr.mxu1 %v3865_v2 }
 0x113   :  { %3078 = vmatprep.subr.mxu0 %v3865_v2  ;;  %3112 = vmatpush3.msra.mxu1 %v4059_v28 }
 0x114   :  { %3079 = vmatpush3.msra.mxu0 %v4392_v30  ;;  %3113 = vmatprep.subr.mxu1 %v3865_v2 }
 0x115   :  { %3080 = vmatprep.subr.mxu0 %v3865_v2  ;;  %3114 = vmatpush3.msra.mxu1 %v4073_v31 }
 0x116   :  { %3081 = vmatpush3.msra.mxu0 %v4401_v32  ;;  %3115 = vmatprep.subr.mxu1 %v3865_v2 }
 0x117   :  { %3083 = vmatmul.mubr.f32.vlgmr.msra.gmra.mxu0 %v3865_v2  ;;  %3120 = vmatprep.subr.mxu0 %v3865_v2 }
 0x118   :  { %3121 = vmatpush3.msra.mxu0 %v4093_v35  ;;  %3116 = vmatpush3.msra.mxu1 %v4082_v33 }
 0x119   :  { %3122 = vmatprep.subr.mxu0 %v3865_v2  ;;  %3117 = vmatprep.mubr.msk.f32.mxu1 %vm3866_vm0, %v3865_v2 }
 0x11a   :  { %3123 = vmatpush3.msra.mxu0 %v4101_v36  ;;  %3152 = vmatprep.mubr.msk.f32.mxu0 %vm3866_vm0, %v3865_v2 }
 0x11b   :  { %3124 = vmatprep.subr.mxu0 %v3865_v2  ;;  %3155 = vmatprep.subr.mxu1 %v3865_v2 }
 0x11c   :  { %3125 = vmatpush3.msra.mxu0 %v4110_v37 }
 0x11d   :  { %3126 = vmatprep.subr.mxu0 %v3865_v2 }
 0x11e   :  { %3127 = vmatpush3.msra.mxu0 %v4119_v38 }
 0x11f   :  { %3128 = vmatprep.subr.mxu0 %v3865_v2 }
 0x120   :  { %3129 = vmatpush3.msra.mxu0 %v4128_v39 }
 0x121   :  { %3130 = vmatprep.subr.mxu0 %v3865_v2 }
 0x122   :  { %3131 = vmatpush3.msra.mxu0 %v4165_v40 }
 0x123   :  { %3132 = vmatprep.subr.mxu0 %v3865_v2 }
 0x124   :  { %3133 = vmatpush3.msra.mxu0 %v4172_v41 }
 0x125   :  { %3134 = vmatprep.subr.mxu0 %v3865_v2 }
 0x126   :  { %3135 = vmatpush3.msra.mxu0 %v4179_v42 }
 0x127   :  { %3136 = vmatprep.subr.mxu0 %v3865_v2 }
 0x128   :  { %3137 = vmatpush3.msra.mxu0 %v4189_v44 }
 0x129   :  { %3138 = vmatprep.subr.mxu0 %v3865_v2 }
 0x12a   :  { %3139 = vmatpush3.msra.mxu0 %v4199_v46 }
 0x12b   :  { %3140 = vmatprep.subr.mxu0 %v3865_v2 }
 0x12c   :  { %3141 = vmatpush3.msra.mxu0 %v4207_v48 }
 0x12d   :  { %3142 = vmatprep.subr.mxu0 %v3865_v2 }
 0x12e   :  { %3143 = vmatpush3.msra.mxu0 %v4217_v50 }
 0x12f   :  { %3144 = vmatprep.subr.mxu0 %v3865_v2 }
 0x130   :  { %3145 = vmatpush3.msra.mxu0 %v4227_v52 }
 0x131   :  { %3146 = vmatprep.subr.mxu0 %v3865_v2 }
 0x132   :  { %3147 = vmatpush3.msra.mxu0 %v4237_v54 }
 0x133   :  { %3148 = vmatprep.subr.mxu0 %v3865_v2 }
 0x134   :  { %3149 = vmatpush3.msra.mxu0 %v4244_v55 }
 0x135   :  { %3150 = vmatprep.subr.mxu0 %v3865_v2 }
 0x136   :  { %3151 = vmatpush3.msra.mxu0 %v4253_v56 }
 0x137   :  { %3190 = vmatprep.subr.mxu0 %v3865_v2 }
 0x1b7   :  { %v342_v58 = vpop.f32.mrf.mxu0  ;;  %v430_v60 = vpop.f32.mrf.mxu1 }
 0x1b8   :  { %v346_v61 = vadd.f32 %v342_v58, %v137_v53  ;;  %v4624_v53 = vld [vmem:[%s5455_s2 + $0x50] sm:$0xff]  ;;  %v4633_v58 = vld [vmem:[%s5455_s2 + $0x48] sm:$0xff] }
 0x1b9   :  { %v3014_v62 = vpop.f32.mrf.mxu0  ;;  %v3049_v63 = vpop.f32.mrf.mxu1 }
 0x1ba   :  { %3833 = vtanh.f32 %v346_v61 }
 0x1c7   :  { %v3834_v1 = vpop.eup %3833 }
 0x1c8   :  { %3118 = vmatmul.mubr.f32.vlgmr.msra.gmra.mxu1 %v3834_v1  ;;  %3153 = vmatmul.mubr.f32.vlgmr.msra.gmra.mxu0 %v3834_v1 }
 0x1c9   :  { %3156 = vmatpush3.msra.mxu1 %v4270_v0  ;;  %3187 = vmatprep.mubr.msk.f32.mxu1 %vm3866_vm0, %v3865_v2 }
 0x1ca   :  { %3157 = vmatprep.subr.mxu1 %v3865_v2  ;;  %3191 = vmatpush3.msra.mxu0 %v3932_v3  ;;  %v4488_v3 = vld [vmem:[%s5460_s6] ss:$0 sm:$0xff] }
 0x1cb   :  { %3158 = vmatpush3.msra.mxu1 %v4275_v5  ;;  %3192 = vmatprep.subr.mxu0 %v3865_v2 }
 0x1cc   :  { %3159 = vmatprep.subr.mxu1 %v3865_v2  ;;  %3193 = vmatpush3.msra.mxu0 %v3940_v4  ;;  %v431_v4 = vadd.f32 %v4488_v3, %v430_v60  ;;  %v4642_v60 = vld [vmem:[%s5455_s2 + $0x40] sm:$0xff] }
 0x1cd   :  { %3160 = vmatpush3.msra.mxu1 %v4284_v7  ;;  %3194 = vmatprep.subr.mxu0 %v3865_v2 }
 0x1ce   :  { %3161 = vmatprep.subr.mxu1 %v3865_v2  ;;  %3195 = vmatpush3.msra.mxu0 %v3949_v6 }
 0x1cf   :  { %3162 = vmatpush3.msra.mxu1 %v4293_v9  ;;  %3196 = vmatprep.subr.mxu0 %v3865_v2 }
 0x1d0   :  { %3163 = vmatprep.subr.mxu1 %v3865_v2  ;;  %3197 = vmatpush3.msra.mxu0 %v3959_v8 }
 0x1d1   :  { %3164 = vmatpush3.msra.mxu1 %v4302_v11  ;;  %3198 = vmatprep.subr.mxu0 %v3865_v2 }
 0x1d2   :  { %3165 = vmatprep.subr.mxu1 %v3865_v2  ;;  %3199 = vmatpush3.msra.mxu0 %v3969_v10 }
 0x1d3   :  { %3166 = vmatpush3.msra.mxu1 %v4311_v13  ;;  %3200 = vmatprep.subr.mxu0 %v3865_v2 }
 0x1d4   :  { %3167 = vmatprep.subr.mxu1 %v3865_v2  ;;  %3201 = vmatpush3.msra.mxu0 %v3979_v12 }
 0x1d5   :  { %3168 = vmatpush3.msra.mxu1 %v4320_v15  ;;  %3202 = vmatprep.subr.mxu0 %v3865_v2 }
 0x1d6   :  { %3169 = vmatprep.subr.mxu1 %v3865_v2  ;;  %3203 = vmatpush3.msra.mxu0 %v3989_v14  ;;  %v142_v14 = vadd.f32 %v4264_v59, %v4452_v43  ;;  %v4615_v43 = vld [vmem:[%s5455_s2 + $0x58] sm:$0xff] }
 0x1d7   :  { %v516_v6 = vpop.f32.mrf.mxu0  ;;  %3170 = vmatpush3.msra.mxu1 %v4329_v17  ;;  %3204 = vmatprep.subr.mxu0 %v3865_v2 }
 0x1d8   :  { %v520_v8 = vadd.f32 %v516_v6, %v431_v4  ;;  %3171 = vmatprep.subr.mxu1 %v3865_v2  ;;  %3205 = vmatpush3.msra.mxu0 %v3999_v16  ;;  %v4938_v6 = vld [vmem:[%s5457_s4 + $0x8] sm:$0xff] }
 0x1d9   :  { %v3084_v10 = vpop.f32.mrf.mxu0  ;;  %3172 = vmatpush3.msra.mxu1 %v4338_v19  ;;  %3206 = vmatprep.subr.mxu0 %v3865_v2 }
 0x1da   :  { %3835 = vtanh.f32 %v520_v8  ;;  %3173 = vmatprep.subr.mxu1 %v3865_v2  ;;  %3207 = vmatpush3.msra.mxu0 %v4009_v18  ;;  %v4945_v8 = vld [vmem:[%s5457_s4] sm:$0xff] }
 0x1db   :  { %3174 = vmatpush3.msra.mxu1 %v4347_v21  ;;  %3208 = vmatprep.subr.mxu0 %v3865_v2  ;;  %v4954_v10 = vld [vmem:[%s5458_s3] ss:$0 sm:$0xff] }
 0x1dc   :  { %3175 = vmatprep.subr.mxu1 %v3865_v2  ;;  %3209 = vmatpush3.msra.mxu0 %v4019_v20 }
 0x1dd   :  { %3176 = vmatpush3.msra.mxu1 %v4356_v23  ;;  %3210 = vmatprep.subr.mxu0 %v3865_v2 }
 0x1de   :  { %3177 = vmatprep.subr.mxu1 %v3865_v2  ;;  %3211 = vmatpush3.msra.mxu0 %v4029_v22 }
 0x1df   :  { %3178 = vmatpush3.msra.mxu1 %v4365_v25  ;;  %3212 = vmatprep.subr.mxu0 %v3865_v2 }
 0x1e0   :  { %3179 = vmatprep.subr.mxu1 %v3865_v2  ;;  %3213 = vmatpush3.msra.mxu0 %v4039_v24 }
 0x1e1   :  { %3180 = vmatpush3.msra.mxu1 %v4374_v27  ;;  %3214 = vmatprep.subr.mxu0 %v3865_v2 }
 0x1e2   :  { %3181 = vmatprep.subr.mxu1 %v3865_v2  ;;  %3215 = vmatpush3.msra.mxu0 %v4049_v26 }
 0x1e3   :  { %3182 = vmatpush3.msra.mxu1 %v4383_v29  ;;  %3216 = vmatprep.subr.mxu0 %v3865_v2 }
 0x1e4   :  { %3183 = vmatprep.subr.mxu1 %v3865_v2  ;;  %3217 = vmatpush3.msra.mxu0 %v4059_v28  ;;  %v4580_v28 = vld [vmem:[%s5455_s2 + $0x78] sm:$0xff] }
 0x1e5   :  { %3184 = vmatpush3.msra.mxu1 %v4392_v30  ;;  %3218 = vmatprep.subr.mxu0 %v3865_v2 }
 0x1e6   :  { %3185 = vmatprep.subr.mxu1 %v3865_v2  ;;  %3219 = vmatpush3.msra.mxu0 %v4073_v31  ;;  %v4588_v31 = vld [vmem:[%s5455_s2 + $0x70] sm:$0xff] }
 0x1e7   :  { %v4531_v12 = vpop.eup %3835  ;;  %3186 = vmatpush3.msra.mxu1 %v4401_v32  ;;  %3220 = vmatprep.subr.mxu0 %v3865_v2 }
 0x1e8   :  { %3188 = vmatmul.mubr.f32.vlgmr.msra.gmra.mxu1 %v4531_v12  ;;  %3225 = vmatprep.subr.mxu1 %v3865_v2 }
 0x1e9   :  { %3226 = vmatpush3.msra.mxu1 %v4093_v35  ;;  %3221 = vmatpush3.msra.mxu0 %v4082_v33  ;;  %v4597_v33 = vld [vmem:[%s5455_s2 + $0x68] sm:$0xff] }
 0x1ea   :  { %3227 = vmatprep.subr.mxu1 %v3865_v2  ;;  %3222 = vmatprep.mubr.msk.f32.mxu0 %vm3866_vm0, %v3865_v2 }
 0x1eb   :  { %3228 = vmatpush3.msra.mxu1 %v4101_v36  ;;  %3257 = vmatprep.mubr.msk.f32.mxu1 %vm3866_vm0, %v3865_v2 }
 0x1ec   :  { %3229 = vmatprep.subr.mxu1 %v3865_v2  ;;  %3260 = vmatprep.subr.mxu0 %v3865_v2 }
 0x1ed   :  { %3230 = vmatpush3.msra.mxu1 %v4110_v37 }
 0x1ee   :  { %3231 = vmatprep.subr.mxu1 %v3865_v2 }
 0x1ef   :  { %3232 = vmatpush3.msra.mxu1 %v4119_v38 }
 0x1f0   :  { %3233 = vmatprep.subr.mxu1 %v3865_v2 }
 0x1f1   :  { %3234 = vmatpush3.msra.mxu1 %v4128_v39 }
 0x1f2   :  { %3235 = vmatprep.subr.mxu1 %v3865_v2 }
 0x1f3   :  { %3236 = vmatpush3.msra.mxu1 %v4165_v40 }
 0x1f4   :  { %3237 = vmatprep.subr.mxu1 %v3865_v2 }
 0x1f5   :  { %3238 = vmatpush3.msra.mxu1 %v4172_v41 }
 0x1f6   :  { %3239 = vmatprep.subr.mxu1 %v3865_v2 }
 0x1f7   :  { %3240 = vmatpush3.msra.mxu1 %v4179_v42 }
 0x1f8   :  { %3241 = vmatprep.subr.mxu1 %v3865_v2 }
 0x1f9   :  { %3242 = vmatpush3.msra.mxu1 %v4189_v44 }
 0x1fa   :  { %3243 = vmatprep.subr.mxu1 %v3865_v2 }
 0x1fb   :  { %3244 = vmatpush3.msra.mxu1 %v4199_v46 }
 0x1fc   :  { %3245 = vmatprep.subr.mxu1 %v3865_v2 }
 0x1fd   :  { %3246 = vmatpush3.msra.mxu1 %v4207_v48 }
 0x1fe   :  { %3247 = vmatprep.subr.mxu1 %v3865_v2 }
 0x1ff   :  { %3248 = vmatpush3.msra.mxu1 %v4217_v50 }
 0x200   :  { %3249 = vmatprep.subr.mxu1 %v3865_v2 }
 0x201   :  { %3250 = vmatpush3.msra.mxu1 %v4227_v52 }
 0x202   :  { %3251 = vmatprep.subr.mxu1 %v3865_v2 }
 0x203   :  { %3252 = vmatpush3.msra.mxu1 %v4237_v54 }
 0x204   :  { %3253 = vmatprep.subr.mxu1 %v3865_v2 }
 0x205   :  { %3254 = vmatpush3.msra.mxu1 %v4244_v55 }
 0x206   :  { %3255 = vmatprep.subr.mxu1 %v3865_v2 }
 0x207   :  { %3256 = vmatpush3.msra.mxu1 %v4253_v56 }
 0x208   :  { %3295 = vmatprep.subr.mxu1 %v3865_v2 }
 0x288   :  { %v607_v16 = vpop.f32.mrf.mxu1  ;;  %v695_v18 = vpop.f32.mrf.mxu0 }
 0x289   :  { %v611_v20 = vadd.f32 %v607_v16, %v142_v14  ;;  %v696_v61 = vadd.f32 %v4488_v3, %v695_v18  ;;  %v152_v14 = vadd.f32 %v4954_v10, %v4456_v47  ;;  %v4975_v47 = vld [vmem:[%s5459_s5 + $0x68] sm:$0xff] }
 0x28a   :  { %v3119_v22 = vpop.f32.mrf.mxu1  ;;  %v3154_v24 = vpop.f32.mrf.mxu0 }
 0x28b   :  { %3837 = vtanh.f32 %v611_v20 }
 0x298   :  { %v3838_v26 = vpop.eup %3837 }
 0x299   :  { %3223 = vmatmul.mubr.f32.vlgmr.msra.gmra.mxu0 %v3838_v26  ;;  %3258 = vmatmul.mubr.f32.vlgmr.msra.gmra.mxu1 %v3838_v26  ;;  %v4961_v26 = vld [vmem:[%s5459_s5 + $0x78] sm:$0xff] }
 0x29a   :  { %3261 = vmatpush3.msra.mxu0 %v4270_v0  ;;  %3292 = vmatprep.mubr.msk.f32.mxu0 %vm3866_vm0, %v3865_v2 }
 0x29b   :  { %3262 = vmatprep.subr.mxu0 %v3865_v2  ;;  %3296 = vmatpush3.msra.mxu1 %v4580_v28 }
 0x29c   :  { %3263 = vmatpush3.msra.mxu0 %v4275_v5  ;;  %3297 = vmatprep.subr.mxu1 %v3865_v2 }
 0x29d   :  { %3264 = vmatprep.subr.mxu0 %v3865_v2  ;;  %3298 = vmatpush3.msra.mxu1 %v4588_v31 }
 0x29e   :  { %3265 = vmatpush3.msra.mxu0 %v4284_v7  ;;  %3299 = vmatprep.subr.mxu1 %v3865_v2 }
 0x29f   :  { %3266 = vmatprep.subr.mxu0 %v3865_v2  ;;  %3300 = vmatpush3.msra.mxu1 %v4597_v33 }
 0x2a0   :  { %3267 = vmatpush3.msra.mxu0 %v4293_v9  ;;  %3301 = vmatprep.subr.mxu1 %v3865_v2 }
 0x2a1   :  { %3268 = vmatprep.subr.mxu0 %v3865_v2  ;;  %3302 = vmatpush3.msra.mxu1 %v4606_v57 }
 0x2a2   :  { %3269 = vmatpush3.msra.mxu0 %v4302_v11  ;;  %3303 = vmatprep.subr.mxu1 %v3865_v2 }
 0x2a3   :  { %3270 = vmatprep.subr.mxu0 %v3865_v2  ;;  %3304 = vmatpush3.msra.mxu1 %v4615_v43 }
 0x2a4   :  { %3271 = vmatpush3.msra.mxu0 %v4311_v13  ;;  %3305 = vmatprep.subr.mxu1 %v3865_v2 }
 0x2a5   :  { %3272 = vmatprep.subr.mxu0 %v3865_v2  ;;  %3306 = vmatpush3.msra.mxu1 %v4624_v53 }
 0x2a6   :  { %3273 = vmatpush3.msra.mxu0 %v4320_v15  ;;  %3307 = vmatprep.subr.mxu1 %v3865_v2 }
 0x2a7   :  { %3274 = vmatprep.subr.mxu0 %v3865_v2  ;;  %3308 = vmatpush3.msra.mxu1 %v4633_v58 }
 0x2a8   :  { %v781_v62 = vpop.f32.mrf.mxu1  ;;  %3275 = vmatpush3.msra.mxu0 %v4329_v17  ;;  %3309 = vmatprep.subr.mxu1 %v3865_v2 }
 0x2a9   :  { %v785_v63 = vadd.f32 %v781_v62, %v696_v61  ;;  %3276 = vmatprep.subr.mxu0 %v3865_v2  ;;  %3310 = vmatpush3.msra.mxu1 %v4642_v60  ;;  %v4966_v62 = vld [vmem:[%s5459_s5 + $0x70] sm:$0xff] }
 0x2aa   :  { %v3189_v1 = vpop.f32.mrf.mxu1  ;;  %3277 = vmatpush3.msra.mxu0 %v4338_v19  ;;  %3311 = vmatprep.subr.mxu1 %v3865_v2 }
 0x2ab   :  { %3839 = vtanh.f32 %v785_v63  ;;  %3278 = vmatprep.subr.mxu0 %v3865_v2  ;;  %3327 = vmatprep.mubr.msk.f32.mxu1 %vm3866_vm0, %v3865_v2  ;;  %v4984_v63 = vld [vmem:[%s5459_s5 + $0x60] sm:$0xff]  ;;  %v4993_v1 = vld [vmem:[%s5459_s5 + $0x58] sm:$0xff] }
 0x2ac   :  { %3279 = vmatpush3.msra.mxu0 %v4347_v21 }
 0x2ad   :  { %3280 = vmatprep.subr.mxu0 %v3865_v2 }
 0x2ae   :  { %3281 = vmatpush3.msra.mxu0 %v4356_v23 }
 0x2af   :  { %3282 = vmatprep.subr.mxu0 %v3865_v2 }
 0x2b0   :  { %3283 = vmatpush3.msra.mxu0 %v4365_v25 }
 0x2b1   :  { %3284 = vmatprep.subr.mxu0 %v3865_v2 }
 0x2b2   :  { %3285 = vmatpush3.msra.mxu0 %v4374_v27 }
 0x2b3   :  { %3286 = vmatprep.subr.mxu0 %v3865_v2 }
 0x2b4   :  { %3287 = vmatpush3.msra.mxu0 %v4383_v29 }
 0x2b5   :  { %3288 = vmatprep.subr.mxu0 %v3865_v2 }
 0x2b6   :  { %3289 = vmatpush3.msra.mxu0 %v4392_v30 }
 0x2b7   :  { %3290 = vmatprep.subr.mxu0 %v3865_v2 }
 0x2b8   :  { %v4668_v4 = vpop.eup %3839  ;;  %3291 = vmatpush3.msra.mxu0 %v4401_v32 }
 0x2b9   :  { %3293 = vmatmul.mubr.f32.vlgmr.msra.gmra.mxu0 %v4668_v4  ;;  %3330 = vmatprep.subr.mxu0 %v3865_v2 }
 0x2ba   :  { %3331 = vmatpush3.msra.mxu0 %v4093_v35  ;;  %3362 = vmatprep.mubr.msk.f32.mxu0 %vm3866_vm0, %v3865_v2  ;;  %v4710_v35 = vld [vmem:[%s5455_s2 + $0x38] sm:$0xff] }
 0x2bb   :  { %3332 = vmatprep.subr.mxu0 %v3865_v2  ;;  %3312 = vmatpush3.msra.mxu1 %v4710_v35 }
 0x2bc   :  { %3333 = vmatpush3.msra.mxu0 %v4101_v36  ;;  %3313 = vmatprep.subr.mxu1 %v3865_v2  ;;  %v4717_v36 = vld [vmem:[%s5455_s2 + $0x30] sm:$0xff] }
 0x2bd   :  { %3334 = vmatprep.subr.mxu0 %v3865_v2  ;;  %3314 = vmatpush3.msra.mxu1 %v4717_v36 }
 0x2be   :  { %3335 = vmatpush3.msra.mxu0 %v4110_v37  ;;  %v4722_v37 = vld [vmem:[%s5455_s2 + $0x28] sm:$0xff]  ;;  %3315 = vmatprep.subr.mxu1 %v3865_v2 }
 0x2bf   :  { %3336 = vmatprep.subr.mxu0 %v3865_v2  ;;  %3316 = vmatpush3.msra.mxu1 %v4722_v37 }
 0x2c0   :  { %3337 = vmatpush3.msra.mxu0 %v4119_v38  ;;  %v4729_v38 = vld [vmem:[%s5455_s2 + $0x20] sm:$0xff]  ;;  %3317 = vmatprep.subr.mxu1 %v3865_v2 }
 0x2c1   :  { %3338 = vmatprep.subr.mxu0 %v3865_v2  ;;  %3318 = vmatpush3.msra.mxu1 %v4729_v38 }
 0x2c2   :  { %3339 = vmatpush3.msra.mxu0 %v4128_v39  ;;  %v4736_v39 = vld [vmem:[%s5455_s2 + $0x18] sm:$0xff]  ;;  %3319 = vmatprep.subr.mxu1 %v3865_v2 }
 0x2c3   :  { %3340 = vmatprep.subr.mxu0 %v3865_v2  ;;  %3320 = vmatpush3.msra.mxu1 %v4736_v39 }
 0x2c4   :  { %3341 = vmatpush3.msra.mxu0 %v4165_v40  ;;  %v4743_v40 = vld [vmem:[%s5455_s2 + $0x10] sm:$0xff]  ;;  %3321 = vmatprep.subr.mxu1 %v3865_v2 }
 0x2c5   :  { %3342 = vmatprep.subr.mxu0 %v3865_v2  ;;  %3322 = vmatpush3.msra.mxu1 %v4743_v40 }
 0x2c6   :  { %3343 = vmatpush3.msra.mxu0 %v4172_v41  ;;  %v4750_v41 = vld [vmem:[%s5455_s2 + $0x8] sm:$0xff]  ;;  %3323 = vmatprep.subr.mxu1 %v3865_v2 }
 0x2c7   :  { %3344 = vmatprep.subr.mxu0 %v3865_v2  ;;  %3324 = vmatpush3.msra.mxu1 %v4750_v41 }
 0x2c8   :  { %3345 = vmatpush3.msra.mxu0 %v4179_v42  ;;  %v4757_v42 = vld [vmem:[%s5455_s2] sm:$0xff]  ;;  %3325 = vmatprep.subr.mxu1 %v3865_v2 }
 0x2c9   :  { %3346 = vmatprep.subr.mxu0 %v3865_v2  ;;  %3326 = vmatpush3.msra.mxu1 %v4757_v42 }
 0x2ca   :  { %3347 = vmatpush3.msra.mxu0 %v4189_v44  ;;  %3365 = vmatprep.subr.mxu1 %v3865_v2  ;;  %v147_v44 = vadd.f32 %v4450_v34, %v4264_v59  ;;  %v4931_v34 = vld [vmem:[%s5457_s4 + $0x10] sm:$0xff] }
 0x2cb   :  { %3348 = vmatprep.subr.mxu0 %v3865_v2 }
 0x2cc   :  { %3349 = vmatpush3.msra.mxu0 %v4199_v46 }
 0x2cd   :  { %3350 = vmatprep.subr.mxu0 %v3865_v2 }
 0x2ce   :  { %3351 = vmatpush3.msra.mxu0 %v4207_v48 }
 0x2cf   :  { %3352 = vmatprep.subr.mxu0 %v3865_v2 }
 0x2d0   :  { %3353 = vmatpush3.msra.mxu0 %v4217_v50 }
 0x2d1   :  { %3354 = vmatprep.subr.mxu0 %v3865_v2 }
 0x2d2   :  { %3355 = vmatpush3.msra.mxu0 %v4227_v52 }
 0x2d3   :  { %3356 = vmatprep.subr.mxu0 %v3865_v2 }
 0x2d4   :  { %3357 = vmatpush3.msra.mxu0 %v4237_v54 }
 0x2d5   :  { %3358 = vmatprep.subr.mxu0 %v3865_v2 }
 0x2d6   :  { %3359 = vmatpush3.msra.mxu0 %v4244_v55 }
 0x2d7   :  { %3360 = vmatprep.subr.mxu0 %v3865_v2 }
 0x2d8   :  { %3361 = vmatpush3.msra.mxu0 %v4253_v56 }
 0x2d9   :  { %3400 = vmatprep.subr.mxu0 %v3865_v2 }
 0x359   :  { %v872_v46 = vpop.f32.mrf.mxu0  ;;  %v960_v48 = vpop.f32.mrf.mxu1 }
 0x35a   :  { %v876_v50 = vadd.f32 %v872_v46, %v147_v44  ;;  %v961_v56 = vadd.f32 %v4488_v3, %v960_v48  ;;  %v5002_v44 = vld [vmem:[%s5459_s5 + $0x50] sm:$0xff]  ;;  %v5011_v46 = vld [vmem:[%s5459_s5 + $0x48] sm:$0xff]  ;;  %v5020_v48 = vld [vmem:[%s5459_s5 + $0x40] sm:$0xff] }
 0x35b   :  { %v3224_v52 = vpop.f32.mrf.mxu0  ;;  %v3259_v54 = vpop.f32.mrf.mxu1 }
 0x35c   :  { %3841 = vtanh.f32 %v876_v50  ;;  %v5030_v52 = vld [vmem:[%s5459_s5 + $0x38] sm:$0xff] }
 0x369   :  { %v3842_v55 = vpop.eup %3841 }
 0x36a   :  { %3328 = vmatmul.mubr.f32.vlgmr.msra.gmra.mxu1 %v3842_v55  ;;  %3363 = vmatmul.mubr.f32.vlgmr.msra.gmra.mxu0 %v3842_v55 }
 0x36b   :  { %3366 = vmatpush3.msra.mxu1 %v4270_v0  ;;  %3397 = vmatprep.mubr.msk.f32.mxu1 %vm3866_vm0, %v3865_v2 }
 0x36c   :  { %3367 = vmatprep.subr.mxu1 %v3865_v2  ;;  %3401 = vmatpush3.msra.mxu0 %v4580_v28 }
 0x36d   :  { %3368 = vmatpush3.msra.mxu1 %v4275_v5  ;;  %3402 = vmatprep.subr.mxu0 %v3865_v2 }
 0x36e   :  { %3369 = vmatprep.subr.mxu1 %v3865_v2  ;;  %3403 = vmatpush3.msra.mxu0 %v4588_v31 }
 0x36f   :  { %3370 = vmatpush3.msra.mxu1 %v4284_v7  ;;  %3404 = vmatprep.subr.mxu0 %v3865_v2  ;;  %v4829_v7 = vld [vmem:[%s5457_s4 + $0x78] sm:$0xff] }
 0x370   :  { %3371 = vmatprep.subr.mxu1 %v3865_v2  ;;  %3405 = vmatpush3.msra.mxu0 %v4597_v33 }
 0x371   :  { %3372 = vmatpush3.msra.mxu1 %v4293_v9  ;;  %3406 = vmatprep.subr.mxu0 %v3865_v2 }
 0x372   :  { %3373 = vmatprep.subr.mxu1 %v3865_v2  ;;  %3407 = vmatpush3.msra.mxu0 %v4606_v57 }
 0x373   :  { %3374 = vmatpush3.msra.mxu1 %v4302_v11  ;;  %3408 = vmatprep.subr.mxu0 %v3865_v2  ;;  %v4841_v11 = vld [vmem:[%s5457_s4 + $0x70] sm:$0xff] }
 0x374   :  { %3375 = vmatprep.subr.mxu1 %v3865_v2  ;;  %3409 = vmatpush3.msra.mxu0 %v4615_v43 }
 0x375   :  { %3376 = vmatpush3.msra.mxu1 %v4311_v13  ;;  %3410 = vmatprep.subr.mxu0 %v3865_v2  ;;  %v4849_v13 = vld [vmem:[%s5457_s4 + $0x68] sm:$0xff] }
 0x376   :  { %3377 = vmatprep.subr.mxu1 %v3865_v2  ;;  %3411 = vmatpush3.msra.mxu0 %v4624_v53 }
 0x377   :  { %3378 = vmatpush3.msra.mxu1 %v4320_v15  ;;  %3412 = vmatprep.subr.mxu0 %v3865_v2  ;;  %v4860_v15 = vld [vmem:[%s5457_s4 + $0x60] sm:$0xff] }
 0x378   :  { %3379 = vmatprep.subr.mxu1 %v3865_v2  ;;  %3413 = vmatpush3.msra.mxu0 %v4633_v58 }
 0x379   :  { %v1046_v59 = vpop.f32.mrf.mxu0  ;;  %3380 = vmatpush3.msra.mxu1 %v4329_v17  ;;  %3414 = vmatprep.subr.mxu0 %v3865_v2  ;;  %v4868_v17 = vld [vmem:[%s5457_s4 + $0x58] sm:$0xff] }
 0x37a   :  { %v1050_v0 = vadd.f32 %v1046_v59, %v961_v56  ;;  %3381 = vmatprep.subr.mxu1 %v3865_v2  ;;  %3415 = vmatpush3.msra.mxu0 %v4642_v60  ;;  %v5048_v59 = vld [vmem:[%s5459_s5 + $0x28] sm:$0xff] }
 0x37b   :  { %v3294_v5 = vpop.f32.mrf.mxu0  ;;  %3382 = vmatpush3.msra.mxu1 %v4338_v19  ;;  %3416 = vmatprep.subr.mxu0 %v3865_v2  ;;  %v4875_v19 = vld [vmem:[%s5457_s4 + $0x50] sm:$0xff] }
 0x37c   :  { %3843 = vtanh.f32 %v1050_v0  ;;  %3383 = vmatprep.subr.mxu1 %v3865_v2  ;;  %3417 = vmatpush3.msra.mxu0 %v4710_v35  ;;  %v5057_v0 = vld [vmem:[%s5459_s5 + $0x20] sm:$0xff]  ;;  %v5066_v5 = vld [vmem:[%s5459_s5 + $0x18] sm:$0xff] }
 0x37d   :  { %3384 = vmatpush3.msra.mxu1 %v4347_v21  ;;  %3418 = vmatprep.subr.mxu0 %v3865_v2  ;;  %v4882_v21 = vld [vmem:[%s5457_s4 + $0x48] sm:$0xff] }
 0x37e   :  { %3385 = vmatprep.subr.mxu1 %v3865_v2  ;;  %3419 = vmatpush3.msra.mxu0 %v4717_v36 }
 0x37f   :  { %3386 = vmatpush3.msra.mxu1 %v4356_v23  ;;  %3420 = vmatprep.subr.mxu0 %v3865_v2  ;;  %v4891_v23 = vld [vmem:[%s5457_s4 + $0x40] sm:$0xff] }
 0x380   :  { %3387 = vmatprep.subr.mxu1 %v3865_v2  ;;  %3421 = vmatpush3.msra.mxu0 %v4722_v37 }
 0x381   :  { %3388 = vmatpush3.msra.mxu1 %v4365_v25  ;;  %3422 = vmatprep.subr.mxu0 %v3865_v2  ;;  %v4898_v25 = vld [vmem:[%s5457_s4 + $0x38] sm:$0xff] }
 0x382   :  { %3389 = vmatprep.subr.mxu1 %v3865_v2  ;;  %3423 = vmatpush3.msra.mxu0 %v4729_v38 }
 0x383   :  { %3390 = vmatpush3.msra.mxu1 %v4374_v27  ;;  %3424 = vmatprep.subr.mxu0 %v3865_v2  ;;  %v4904_v27 = vld [vmem:[%s5457_s4 + $0x30] sm:$0xff] }
 0x384   :  { %3391 = vmatprep.subr.mxu1 %v3865_v2  ;;  %3425 = vmatpush3.msra.mxu0 %v4736_v39 }
 0x385   :  { %3392 = vmatpush3.msra.mxu1 %v4383_v29  ;;  %3426 = vmatprep.subr.mxu0 %v3865_v2  ;;  %v4910_v29 = vld [vmem:[%s5457_s4 + $0x28] sm:$0xff] }
 0x386   :  { %3393 = vmatprep.subr.mxu1 %v3865_v2  ;;  %3427 = vmatpush3.msra.mxu0 %v4743_v40 }
 0x387   :  { %3394 = vmatpush3.msra.mxu1 %v4392_v30  ;;  %3428 = vmatprep.subr.mxu0 %v3865_v2  ;;  %v4917_v30 = vld [vmem:[%s5457_s4 + $0x20] sm:$0xff] }
 0x388   :  { %3395 = vmatprep.subr.mxu1 %v3865_v2  ;;  %3429 = vmatpush3.msra.mxu0 %v4750_v41 }
 0x389   :  { %v4832_v9 = vpop.eup %3843  ;;  %3396 = vmatpush3.msra.mxu1 %v4401_v32  ;;  %3430 = vmatprep.subr.mxu0 %v3865_v2  ;;  %v4924_v32 = vld [vmem:[%s5457_s4 + $0x18] sm:$0xff] }
 0x38a   :  { %3398 = vmatmul.mubr.f32.vlgmr.msra.gmra.mxu1 %v4832_v9  ;;  %3435 = vmatprep.subr.mxu1 %v3865_v2 }
 0x38b   :  { %3436 = vmatpush3.msra.mxu1 %v4829_v7  ;;  %3431 = vmatpush3.msra.mxu0 %v4757_v42 }
 0x38c   :  { %3437 = vmatprep.subr.mxu1 %v3865_v2  ;;  %3432 = vmatprep.mubr.msk.f32.mxu0 %vm3866_vm0, %v3865_v2 }
 0x38d   :  { %3438 = vmatpush3.msra.mxu1 %v4841_v11  ;;  %3467 = vmatprep.mubr.msk.f32.mxu1 %vm3866_vm0, %v3865_v2 }
 0x38e   :  { %3439 = vmatprep.subr.mxu1 %v3865_v2  ;;  %3470 = vmatprep.subr.mxu0 %v3865_v2 }
 0x38f   :  { %3440 = vmatpush3.msra.mxu1 %v4849_v13 }
 0x390   :  { %3441 = vmatprep.subr.mxu1 %v3865_v2 }
 0x391   :  { %3442 = vmatpush3.msra.mxu1 %v4860_v15 }
 0x392   :  { %3443 = vmatprep.subr.mxu1 %v3865_v2 }
 0x393   :  { %3444 = vmatpush3.msra.mxu1 %v4868_v17 }
 0x394   :  { %3445 = vmatprep.subr.mxu1 %v3865_v2 }
 0x395   :  { %3446 = vmatpush3.msra.mxu1 %v4875_v19 }
 0x396   :  { %3447 = vmatprep.subr.mxu1 %v3865_v2 }
 0x397   :  { %3448 = vmatpush3.msra.mxu1 %v4882_v21 }
 0x398   :  { %3449 = vmatprep.subr.mxu1 %v3865_v2 }
 0x399   :  { %3450 = vmatpush3.msra.mxu1 %v4891_v23 }
 0x39a   :  { %3451 = vmatprep.subr.mxu1 %v3865_v2 }
 0x39b   :  { %3452 = vmatpush3.msra.mxu1 %v4898_v25 }
 0x39c   :  { %3453 = vmatprep.subr.mxu1 %v3865_v2 }
 0x39d   :  { %3454 = vmatpush3.msra.mxu1 %v4904_v27 }
 0x39e   :  { %3455 = vmatprep.subr.mxu1 %v3865_v2 }
 0x39f   :  { %3456 = vmatpush3.msra.mxu1 %v4910_v29 }
 0x3a0   :  { %3457 = vmatprep.subr.mxu1 %v3865_v2 }
 0x3a1   :  { %3458 = vmatpush3.msra.mxu1 %v4917_v30 }
 0x3a2   :  { %3459 = vmatprep.subr.mxu1 %v3865_v2 }
 0x3a3   :  { %3460 = vmatpush3.msra.mxu1 %v4924_v32 }
 0x3a4   :  { %3461 = vmatprep.subr.mxu1 %v3865_v2 }
 0x3a5   :  { %3462 = vmatpush3.msra.mxu1 %v4931_v34 }
 0x3a6   :  { %3463 = vmatprep.subr.mxu1 %v3865_v2 }
 0x3a7   :  { %3464 = vmatpush3.msra.mxu1 %v4938_v6 }
 0x3a8   :  { %3465 = vmatprep.subr.mxu1 %v3865_v2 }
 0x3a9   :  { %3466 = vmatpush3.msra.mxu1 %v4945_v8 }
 0x3aa   :  { %3505 = vmatprep.subr.mxu1 %v3865_v2 }
 0x42a   :  { %v1137_v16 = vpop.f32.mrf.mxu1  ;;  %v1225_v18 = vpop.f32.mrf.mxu0 }
 0x42b   :  { %v1141_v20 = vadd.f32 %v1137_v16, %v152_v14  ;;  %v1226_v50 = vadd.f32 %v4488_v3, %v1225_v18  ;;  %v5039_v3 = vld [vmem:[%s5459_s5 + $0x30] sm:$0xff]  ;;  %v5084_v16 = vld [vmem:[%s5459_s5 + $0x8] sm:$0xff]  ;;  %v5093_v18 = vld [vmem:[%s5459_s5] sm:$0xff] }
 0x42c   :  { %v3329_v22 = vpop.f32.mrf.mxu1  ;;  %v3364_v24 = vpop.f32.mrf.mxu0  ;;  %v5075_v14 = vld [vmem:[%s5459_s5 + $0x10] sm:$0xff] }
 0x42d   :  { %3845 = vtanh.f32 %v1141_v20  ;;  %v157_v22 = vadd.f32 %v4954_v10, %v4454_v45  ;;  %v5176_v45 = vld [vmem:[%s5460_s6] ss:$0 sm:$0xff] }
 0x43a   :  { %v3846_v61 = vpop.eup %3845 }
 0x43b   :  { %3433 = vmatmul.mubr.f32.vlgmr.msra.gmra.mxu0 %v3846_v61  ;;  %3468 = vmatmul.mubr.f32.vlgmr.msra.gmra.mxu1 %v3846_v61 }
 0x43c   :  { %3471 = vmatpush3.msra.mxu0 %v4961_v26  ;;  %3502 = vmatprep.mubr.msk.f32.mxu0 %vm3866_vm0, %v3865_v2 }
 0x43d   :  { %3472 = vmatprep.subr.mxu0 %v3865_v2  ;;  %3506 = vmatpush3.msra.mxu1 %v4580_v28 }
 0x43e   :  { %3473 = vmatpush3.msra.mxu0 %v4966_v62  ;;  %3507 = vmatprep.subr.mxu1 %v3865_v2 }
 0x43f   :  { %3474 = vmatprep.subr.mxu0 %v3865_v2  ;;  %3508 = vmatpush3.msra.mxu1 %v4588_v31 }
 0x440   :  { %3475 = vmatpush3.msra.mxu0 %v4975_v47  ;;  %3509 = vmatprep.subr.mxu1 %v3865_v2 }
 0x441   :  { %3476 = vmatprep.subr.mxu0 %v3865_v2  ;;  %3510 = vmatpush3.msra.mxu1 %v4597_v33 }
 0x442   :  { %3477 = vmatpush3.msra.mxu0 %v4984_v63  ;;  %3511 = vmatprep.subr.mxu1 %v3865_v2 }
 0x443   :  { %3478 = vmatprep.subr.mxu0 %v3865_v2  ;;  %3512 = vmatpush3.msra.mxu1 %v4606_v57 }
 0x444   :  { %3479 = vmatpush3.msra.mxu0 %v4993_v1  ;;  %3513 = vmatprep.subr.mxu1 %v3865_v2 }
 0x445   :  { %3480 = vmatprep.subr.mxu0 %v3865_v2  ;;  %3514 = vmatpush3.msra.mxu1 %v4615_v43 }
 0x446   :  { %3481 = vmatpush3.msra.mxu0 %v5002_v44  ;;  %3515 = vmatprep.subr.mxu1 %v3865_v2 }
 0x447   :  { %3482 = vmatprep.subr.mxu0 %v3865_v2  ;;  %3516 = vmatpush3.msra.mxu1 %v4624_v53 }
 0x448   :  { %3483 = vmatpush3.msra.mxu0 %v5011_v46  ;;  %3517 = vmatprep.subr.mxu1 %v3865_v2 }
 0x449   :  { %3484 = vmatprep.subr.mxu0 %v3865_v2  ;;  %3518 = vmatpush3.msra.mxu1 %v4633_v58 }
 0x44a   :  { %v1311_v54 = vpop.f32.mrf.mxu1  ;;  %3485 = vmatpush3.msra.mxu0 %v5020_v48  ;;  %3519 = vmatprep.subr.mxu1 %v3865_v2 }
 0x44b   :  { %v1315_v55 = vadd.f32 %v1311_v54, %v1226_v50  ;;  %3486 = vmatprep.subr.mxu0 %v3865_v2  ;;  %3520 = vmatpush3.msra.mxu1 %v4642_v60 }
 0x44c   :  { %v3399_v56 = vpop.f32.mrf.mxu1  ;;  %3487 = vmatpush3.msra.mxu0 %v5030_v52  ;;  %3521 = vmatprep.subr.mxu1 %v3865_v2 }
 0x44d   :  { %3847 = vtanh.f32 %v1315_v55  ;;  %3488 = vmatprep.subr.mxu0 %v3865_v2  ;;  %3522 = vmatpush3.msra.mxu1 %v4710_v35 }
 0x44e   :  { %3489 = vmatpush3.msra.mxu0 %v5039_v3  ;;  %3523 = vmatprep.subr.mxu1 %v3865_v2 }
 0x44f   :  { %3490 = vmatprep.subr.mxu0 %v3865_v2  ;;  %3524 = vmatpush3.msra.mxu1 %v4717_v36 }
 0x450   :  { %3491 = vmatpush3.msra.mxu0 %v5048_v59  ;;  %3525 = vmatprep.subr.mxu1 %v3865_v2 }
 0x451   :  { %3492 = vmatprep.subr.mxu0 %v3865_v2  ;;  %3526 = vmatpush3.msra.mxu1 %v4722_v37 }
 0x452   :  { %3493 = vmatpush3.msra.mxu0 %v5057_v0  ;;  %3527 = vmatprep.subr.mxu1 %v3865_v2 }
 0x453   :  { %3494 = vmatprep.subr.mxu0 %v3865_v2  ;;  %3528 = vmatpush3.msra.mxu1 %v4729_v38 }
 0x454   :  { %3495 = vmatpush3.msra.mxu0 %v5066_v5  ;;  %3529 = vmatprep.subr.mxu1 %v3865_v2 }
 0x455   :  { %3496 = vmatprep.subr.mxu0 %v3865_v2  ;;  %3530 = vmatpush3.msra.mxu1 %v4736_v39 }
 0x456   :  { %3497 = vmatpush3.msra.mxu0 %v5075_v14  ;;  %3531 = vmatprep.subr.mxu1 %v3865_v2 }
 0x457   :  { %3498 = vmatprep.subr.mxu0 %v3865_v2  ;;  %3532 = vmatpush3.msra.mxu1 %v4743_v40 }
 0x458   :  { %3499 = vmatpush3.msra.mxu0 %v5084_v16  ;;  %3533 = vmatprep.subr.mxu1 %v3865_v2 }
 0x459   :  { %3500 = vmatprep.subr.mxu0 %v3865_v2  ;;  %3534 = vmatpush3.msra.mxu1 %v4750_v41 }
 0x45a   :  { %v5100_v20 = vpop.eup %3847  ;;  %3501 = vmatpush3.msra.mxu0 %v5093_v18  ;;  %3535 = vmatprep.subr.mxu1 %v3865_v2 }
 0x45b   :  { %3503 = vmatmul.mubr.f32.vlgmr.msra.gmra.mxu0 %v5100_v20  ;;  %3540 = vmatprep.subr.mxu0 %v3865_v2 }
 0x45c   :  { %3541 = vmatpush3.msra.mxu0 %v4829_v7  ;;  %3536 = vmatpush3.msra.mxu1 %v4757_v42 }
 0x45d   :  { %3542 = vmatprep.subr.mxu0 %v3865_v2  ;;  %3537 = vmatprep.mubr.msk.f32.mxu1 %vm3866_vm0, %v3865_v2 }
 0x45e   :  { %3543 = vmatpush3.msra.mxu0 %v4841_v11  ;;  %3572 = vmatprep.mubr.msk.f32.mxu0 %vm3866_vm0, %v3865_v2 }
 0x45f   :  { %3544 = vmatprep.subr.mxu0 %v3865_v2  ;;  %3575 = vmatprep.subr.mxu1 %v3865_v2 }
 0x460   :  { %3545 = vmatpush3.msra.mxu0 %v4849_v13 }
 0x461   :  { %3546 = vmatprep.subr.mxu0 %v3865_v2 }
 0x462   :  { %3547 = vmatpush3.msra.mxu0 %v4860_v15 }
 0x463   :  { %3548 = vmatprep.subr.mxu0 %v3865_v2 }
 0x464   :  { %3549 = vmatpush3.msra.mxu0 %v4868_v17 }
 0x465   :  { %3550 = vmatprep.subr.mxu0 %v3865_v2 }
 0x466   :  { %3551 = vmatpush3.msra.mxu0 %v4875_v19 }
 0x467   :  { %3552 = vmatprep.subr.mxu0 %v3865_v2 }
 0x468   :  { %3553 = vmatpush3.msra.mxu0 %v4882_v21 }
 0x469   :  { %3554 = vmatprep.subr.mxu0 %v3865_v2 }
 0x46a   :  { %3555 = vmatpush3.msra.mxu0 %v4891_v23 }
 0x46b   :  { %3556 = vmatprep.subr.mxu0 %v3865_v2 }
 0x46c   :  { %3557 = vmatpush3.msra.mxu0 %v4898_v25 }
 0x46d   :  { %3558 = vmatprep.subr.mxu0 %v3865_v2 }
 0x46e   :  { %3559 = vmatpush3.msra.mxu0 %v4904_v27 }
 0x46f   :  { %3560 = vmatprep.subr.mxu0 %v3865_v2 }
 0x470   :  { %3561 = vmatpush3.msra.mxu0 %v4910_v29 }
 0x471   :  { %3562 = vmatprep.subr.mxu0 %v3865_v2 }
 0x472   :  { %3563 = vmatpush3.msra.mxu0 %v4917_v30 }
 0x473   :  { %3564 = vmatprep.subr.mxu0 %v3865_v2 }
 0x474   :  { %3565 = vmatpush3.msra.mxu0 %v4924_v32 }
 0x475   :  { %3566 = vmatprep.subr.mxu0 %v3865_v2 }
 0x476   :  { %3567 = vmatpush3.msra.mxu0 %v4931_v34 }
 0x477   :  { %3568 = vmatprep.subr.mxu0 %v3865_v2 }
 0x478   :  { %3569 = vmatpush3.msra.mxu0 %v4938_v6 }
 0x479   :  { %3570 = vmatprep.subr.mxu0 %v3865_v2 }
 0x47a   :  { %3571 = vmatpush3.msra.mxu0 %v4945_v8 }
 0x47b   :  { %3610 = vmatprep.subr.mxu0 %v3865_v2 }
 0x4fb   :  { %v1402_v24 = vpop.f32.mrf.mxu0  ;;  %v1490_v61 = vpop.f32.mrf.mxu1 }
 0x4fc   :  { %v1406_v50 = vadd.f32 %v1402_v24, %v157_v22 }
 0x4fd   :  { %v3434_v54 = vpop.f32.mrf.mxu0  ;;  %v3469_v55 = vpop.f32.mrf.mxu1 }
 0x4fe   :  { %3849 = vtanh.f32 %v1406_v50 }
 0x50b   :  { %v3850_v56 = vpop.eup %3849 }
 0x50c   :  { %3538 = vmatmul.mubr.f32.vlgmr.msra.gmra.mxu1 %v3850_v56  ;;  %3573 = vmatmul.mubr.f32.vlgmr.msra.gmra.mxu0 %v3850_v56 }
 0x50d   :  { %3576 = vmatpush3.msra.mxu1 %v4961_v26  ;;  %3607 = vmatprep.mubr.msk.f32.mxu1 %vm3866_vm0, %v3865_v2 }
 0x50e   :  { %3577 = vmatprep.subr.mxu1 %v3865_v2  ;;  %3611 = vmatpush3.msra.mxu0 %v4580_v28  ;;  %v1491_v28 = vadd.f32 %v5176_v45, %v1490_v61 }
 0x50f   :  { %3578 = vmatpush3.msra.mxu1 %v4966_v62  ;;  %3612 = vmatprep.subr.mxu0 %v3865_v2 }
 0x510   :  { %3579 = vmatprep.subr.mxu1 %v3865_v2  ;;  %3613 = vmatpush3.msra.mxu0 %v4588_v31 }
 0x511   :  { %3580 = vmatpush3.msra.mxu1 %v4975_v47  ;;  %3614 = vmatprep.subr.mxu0 %v3865_v2 }
 0x512   :  { %3581 = vmatprep.subr.mxu1 %v3865_v2  ;;  %3615 = vmatpush3.msra.mxu0 %v4597_v33 }
 0x513   :  { %3582 = vmatpush3.msra.mxu1 %v4984_v63  ;;  %3616 = vmatprep.subr.mxu0 %v3865_v2 }
 0x514   :  { %3583 = vmatprep.subr.mxu1 %v3865_v2  ;;  %3617 = vmatpush3.msra.mxu0 %v4606_v57 }
 0x515   :  { %3584 = vmatpush3.msra.mxu1 %v4993_v1  ;;  %3618 = vmatprep.subr.mxu0 %v3865_v2 }
 0x516   :  { %3585 = vmatprep.subr.mxu1 %v3865_v2  ;;  %3619 = vmatpush3.msra.mxu0 %v4615_v43 }
 0x517   :  { %3586 = vmatpush3.msra.mxu1 %v5002_v44  ;;  %3620 = vmatprep.subr.mxu0 %v3865_v2 }
 0x518   :  { %3587 = vmatprep.subr.mxu1 %v3865_v2  ;;  %3621 = vmatpush3.msra.mxu0 %v4624_v53  ;;  %v162_v53 = vadd.f32 %v4954_v10, %v4460_v51 }
 0x519   :  { %3588 = vmatpush3.msra.mxu1 %v5011_v46  ;;  %3622 = vmatprep.subr.mxu0 %v3865_v2 }
 0x51a   :  { %3589 = vmatprep.subr.mxu1 %v3865_v2  ;;  %3623 = vmatpush3.msra.mxu0 %v4633_v58 }
 0x51b   :  { %v1576_v31 = vpop.f32.mrf.mxu0  ;;  %3590 = vmatpush3.msra.mxu1 %v5020_v48  ;;  %3624 = vmatprep.subr.mxu0 %v3865_v2 }
 0x51c   :  { %v1580_v33 = vadd.f32 %v1576_v31, %v1491_v28  ;;  %3591 = vmatprep.subr.mxu1 %v3865_v2  ;;  %3625 = vmatpush3.msra.mxu0 %v4642_v60 }
 0x51d   :  { %v3504_v57 = vpop.f32.mrf.mxu0  ;;  %3592 = vmatpush3.msra.mxu1 %v5030_v52  ;;  %3626 = vmatprep.subr.mxu0 %v3865_v2 }
 0x51e   :  { %3851 = vtanh.f32 %v1580_v33  ;;  %3593 = vmatprep.subr.mxu1 %v3865_v2  ;;  %3627 = vmatpush3.msra.mxu0 %v4710_v35 }
 0x51f   :  { %3594 = vmatpush3.msra.mxu1 %v5039_v3  ;;  %3628 = vmatprep.subr.mxu0 %v3865_v2 }
 0x520   :  { %3595 = vmatprep.subr.mxu1 %v3865_v2  ;;  %3629 = vmatpush3.msra.mxu0 %v4717_v36 }
 0x521   :  { %3596 = vmatpush3.msra.mxu1 %v5048_v59  ;;  %3630 = vmatprep.subr.mxu0 %v3865_v2 }
 0x522   :  { %3597 = vmatprep.subr.mxu1 %v3865_v2  ;;  %3631 = vmatpush3.msra.mxu0 %v4722_v37 }
 0x523   :  { %3598 = vmatpush3.msra.mxu1 %v5057_v0  ;;  %3632 = vmatprep.subr.mxu0 %v3865_v2 }
 0x524   :  { %3599 = vmatprep.subr.mxu1 %v3865_v2  ;;  %3633 = vmatpush3.msra.mxu0 %v4729_v38 }
 0x525   :  { %3600 = vmatpush3.msra.mxu1 %v5066_v5  ;;  %3634 = vmatprep.subr.mxu0 %v3865_v2 }
 0x526   :  { %3601 = vmatprep.subr.mxu1 %v3865_v2  ;;  %3635 = vmatpush3.msra.mxu0 %v4736_v39 }
 0x527   :  { %3602 = vmatpush3.msra.mxu1 %v5075_v14  ;;  %3636 = vmatprep.subr.mxu0 %v3865_v2 }
 0x528   :  { %3603 = vmatprep.subr.mxu1 %v3865_v2  ;;  %3637 = vmatpush3.msra.mxu0 %v4743_v40 }
 0x529   :  { %3604 = vmatpush3.msra.mxu1 %v5084_v16  ;;  %3638 = vmatprep.subr.mxu0 %v3865_v2 }
 0x52a   :  { %3605 = vmatprep.subr.mxu1 %v3865_v2  ;;  %3639 = vmatpush3.msra.mxu0 %v4750_v41 }
 0x52b   :  { %v5213_v43 = vpop.eup %3851  ;;  %3606 = vmatpush3.msra.mxu1 %v5093_v18  ;;  %3640 = vmatprep.subr.mxu0 %v3865_v2 }
 0x52c   :  { %3608 = vmatmul.mubr.f32.vlgmr.msra.gmra.mxu1 %v5213_v43  ;;  %3645 = vmatprep.subr.mxu1 %v3865_v2 }
 0x52d   :  { %3646 = vmatpush3.msra.mxu1 %v4829_v7  ;;  %3641 = vmatpush3.msra.mxu0 %v4757_v42 }
 0x52e   :  { %3647 = vmatprep.subr.mxu1 %v3865_v2  ;;  %3642 = vmatprep.mubr.msk.f32.mxu0 %vm3866_vm0, %v3865_v2 }
 0x52f   :  { %3648 = vmatpush3.msra.mxu1 %v4841_v11  ;;  %3677 = vmatprep.mubr.msk.f32.mxu1 %vm3866_vm0, %v3865_v2 }
 0x530   :  { %3649 = vmatprep.subr.mxu1 %v3865_v2  ;;  %3680 = vmatprep.subr.mxu0 %v3865_v2 }
 0x531   :  { %3650 = vmatpush3.msra.mxu1 %v4849_v13 }
 0x532   :  { %3651 = vmatprep.subr.mxu1 %v3865_v2 }
 0x533   :  { %3652 = vmatpush3.msra.mxu1 %v4860_v15 }
 0x534   :  { %3653 = vmatprep.subr.mxu1 %v3865_v2 }
 0x535   :  { %3654 = vmatpush3.msra.mxu1 %v4868_v17 }
 0x536   :  { %3655 = vmatprep.subr.mxu1 %v3865_v2 }
 0x537   :  { %3656 = vmatpush3.msra.mxu1 %v4875_v19 }
 0x538   :  { %3657 = vmatprep.subr.mxu1 %v3865_v2 }
 0x539   :  { %3658 = vmatpush3.msra.mxu1 %v4882_v21 }
 0x53a   :  { %3659 = vmatprep.subr.mxu1 %v3865_v2 }
 0x53b   :  { %3660 = vmatpush3.msra.mxu1 %v4891_v23 }
 0x53c   :  { %3661 = vmatprep.subr.mxu1 %v3865_v2 }
 0x53d   :  { %3662 = vmatpush3.msra.mxu1 %v4898_v25 }
 0x53e   :  { %3663 = vmatprep.subr.mxu1 %v3865_v2 }
 0x53f   :  { %3664 = vmatpush3.msra.mxu1 %v4904_v27 }
 0x540   :  { %3665 = vmatprep.subr.mxu1 %v3865_v2 }
 0x541   :  { %3666 = vmatpush3.msra.mxu1 %v4910_v29 }
 0x542   :  { %3667 = vmatprep.subr.mxu1 %v3865_v2 }
 0x543   :  { %3668 = vmatpush3.msra.mxu1 %v4917_v30 }
 0x544   :  { %3669 = vmatprep.subr.mxu1 %v3865_v2 }
 0x545   :  { %3670 = vmatpush3.msra.mxu1 %v4924_v32 }
 0x546   :  { %3671 = vmatprep.subr.mxu1 %v3865_v2 }
 0x547   :  { %3672 = vmatpush3.msra.mxu1 %v4931_v34 }
 0x548   :  { %3673 = vmatprep.subr.mxu1 %v3865_v2 }
 0x549   :  { %3674 = vmatpush3.msra.mxu1 %v4938_v6 }
 0x54a   :  { %3675 = vmatprep.subr.mxu1 %v3865_v2 }
 0x54b   :  { %3676 = vmatpush3.msra.mxu1 %v4945_v8 }
 0x54c   :  { %3715 = vmatprep.subr.mxu1 %v3865_v2 }
 0x5cc   :  { %v1667_v58 = vpop.f32.mrf.mxu1  ;;  %v1755_v60 = vpop.f32.mrf.mxu0 }
 0x5cd   :  { %v1671_v35 = vadd.f32 %v1667_v58, %v162_v53  ;;  %v1756_v51 = vadd.f32 %v5176_v45, %v1755_v60 }
 0x5ce   :  { %v3539_v36 = vpop.f32.mrf.mxu1  ;;  %v3574_v37 = vpop.f32.mrf.mxu0 }
 0x5cf   :  { %3853 = vtanh.f32 %v1671_v35 }
 0x5dc   :  { %v3854_v38 = vpop.eup %3853 }
 0x5dd   :  { %3643 = vmatmul.mubr.f32.vlgmr.msra.gmra.mxu0 %v3854_v38  ;;  %3678 = vmatmul.mubr.f32.vlgmr.msra.gmra.mxu1 %v3854_v38 }
 0x5de   :  { %3681 = vmatpush3.msra.mxu0 %v4961_v26  ;;  %3712 = vmatprep.mubr.msk.f32.mxu0 %vm3866_vm0, %v3865_v2 }
 0x5df   :  { %3682 = vmatprep.subr.mxu0 %v3865_v2  ;;  %3716 = vmatpush3.msra.mxu1 %v4829_v7  ;;  %v2313_v7 = vld [vmem:[%s5461_s7 + $0x78] sm:$0xff] }
 0x5e0   :  { %3683 = vmatpush3.msra.mxu0 %v4966_v62  ;;  %3717 = vmatprep.subr.mxu1 %v3865_v2 }
 0x5e1   :  { %3684 = vmatprep.subr.mxu0 %v3865_v2  ;;  %3718 = vmatpush3.msra.mxu1 %v4841_v11  ;;  %v167_v11 = vadd.f32 %v4954_v10, %v4458_v49  ;;  %v2311_v49 = vld [vmem:[%s5461_s7 + $0x68] sm:$0xff] }
 0x5e2   :  { %3685 = vmatpush3.msra.mxu0 %v4975_v47  ;;  %3719 = vmatprep.subr.mxu1 %v3865_v2 }
 0x5e3   :  { %3686 = vmatprep.subr.mxu0 %v3865_v2  ;;  %3720 = vmatpush3.msra.mxu1 %v4849_v13 }
 0x5e4   :  { %3687 = vmatpush3.msra.mxu0 %v4984_v63  ;;  %3721 = vmatprep.subr.mxu1 %v3865_v2 }
 0x5e5   :  { %3688 = vmatprep.subr.mxu0 %v3865_v2  ;;  %3722 = vmatpush3.msra.mxu1 %v4860_v15 }
 0x5e6   :  { %3689 = vmatpush3.msra.mxu0 %v4993_v1  ;;  %3723 = vmatprep.subr.mxu1 %v3865_v2 }
 0x5e7   :  { %3690 = vmatprep.subr.mxu0 %v3865_v2  ;;  %3724 = vmatpush3.msra.mxu1 %v4868_v17 }
 0x5e8   :  { %3691 = vmatpush3.msra.mxu0 %v5002_v44  ;;  %3725 = vmatprep.subr.mxu1 %v3865_v2 }
 0x5e9   :  { %3692 = vmatprep.subr.mxu0 %v3865_v2  ;;  %3726 = vmatpush3.msra.mxu1 %v4875_v19 }
 0x5ea   :  { %3693 = vmatpush3.msra.mxu0 %v5011_v46  ;;  %3727 = vmatprep.subr.mxu1 %v3865_v2 }
 0x5eb   :  { %3694 = vmatprep.subr.mxu0 %v3865_v2  ;;  %3728 = vmatpush3.msra.mxu1 %v4882_v21 }
 0x5ec   :  { %v1841_v39 = vpop.f32.mrf.mxu1  ;;  %3695 = vmatpush3.msra.mxu0 %v5020_v48  ;;  %3729 = vmatprep.subr.mxu1 %v3865_v2 }
 0x5ed   :  { %v1845_v40 = vadd.f32 %v1841_v39, %v1756_v51  ;;  %3696 = vmatprep.subr.mxu0 %v3865_v2  ;;  %3730 = vmatpush3.msra.mxu1 %v4891_v23 }
 0x5ee   :  { %v3609_v41 = vpop.f32.mrf.mxu1  ;;  %3697 = vmatpush3.msra.mxu0 %v5030_v52  ;;  %3731 = vmatprep.subr.mxu1 %v3865_v2 }
 0x5ef   :  { %3855 = vtanh.f32 %v1845_v40  ;;  %3698 = vmatprep.subr.mxu0 %v3865_v2  ;;  %3732 = vmatpush3.msra.mxu1 %v4898_v25  ;;  %v2310_v25 = vld [vmem:[%s5461_s7 + $0x60] sm:$0xff] }
 0x5f0   :  { %3699 = vmatpush3.msra.mxu0 %v5039_v3  ;;  %3733 = vmatprep.subr.mxu1 %v3865_v2 }
 0x5f1   :  { %3700 = vmatprep.subr.mxu0 %v3865_v2  ;;  %3734 = vmatpush3.msra.mxu1 %v4904_v27  ;;  %v2309_v27 = vld [vmem:[%s5461_s7 + $0x58] sm:$0xff] }
 0x5f2   :  { %3701 = vmatpush3.msra.mxu0 %v5048_v59  ;;  %3735 = vmatprep.subr.mxu1 %v3865_v2 }
 0x5f3   :  { %3702 = vmatprep.subr.mxu0 %v3865_v2  ;;  %3736 = vmatpush3.msra.mxu1 %v4910_v29  ;;  %v2307_v29 = vld [vmem:[%s5461_s7 + $0x48] sm:$0xff] }
 0x5f4   :  { %3703 = vmatpush3.msra.mxu0 %v5057_v0  ;;  %3737 = vmatprep.subr.mxu1 %v3865_v2 }
 0x5f5   :  { %3704 = vmatprep.subr.mxu0 %v3865_v2  ;;  %3738 = vmatpush3.msra.mxu1 %v4917_v30  ;;  %v2306_v30 = vld [vmem:[%s5461_s7 + $0x40] sm:$0xff] }
 0x5f6   :  { %3705 = vmatpush3.msra.mxu0 %v5066_v5  ;;  %3739 = vmatprep.subr.mxu1 %v3865_v2 }
 0x5f7   :  { %3706 = vmatprep.subr.mxu0 %v3865_v2  ;;  %3740 = vmatpush3.msra.mxu1 %v4924_v32  ;;  %v2305_v32 = vld [vmem:[%s5461_s7 + $0x38] sm:$0xff] }
 0x5f8   :  { %3707 = vmatpush3.msra.mxu0 %v5075_v14  ;;  %3741 = vmatprep.subr.mxu1 %v3865_v2 }
 0x5f9   :  { %3708 = vmatprep.subr.mxu0 %v3865_v2  ;;  %3742 = vmatpush3.msra.mxu1 %v4931_v34 }
 0x5fa   :  { %3709 = vmatpush3.msra.mxu0 %v5084_v16  ;;  %3743 = vmatprep.subr.mxu1 %v3865_v2 }
 0x5fb   :  { %3710 = vmatprep.subr.mxu0 %v3865_v2  ;;  %3744 = vmatpush3.msra.mxu1 %v4938_v6 }
 0x5fc   :  { %v5321_v42 = vpop.eup %3855  ;;  %3711 = vmatpush3.msra.mxu0 %v5093_v18  ;;  %3745 = vmatprep.subr.mxu1 %v3865_v2 }
 0x5fd   :  { %3713 = vmatmul.mubr.f32.vlgmr.msra.gmra.mxu0 %v5321_v42  ;;  %3746 = vmatpush3.msra.mxu1 %v4945_v8  ;;  %v2304_v8 = vld [vmem:[%s5461_s7 + $0x30] sm:$0xff] }
 0x5fe   :  { %3747 = vmatprep.mubr.msk.f32.mxu1 %vm3866_vm0, %v3865_v2  ;;  %3750 = vmatprep.subr.mxu0 %v3865_v2 }
 0x5ff   :  { %3751 = vmatpush3.msra.mxu0 %v4961_v26  ;;  %3782 = vmatprep.mubr.msk.f32.mxu0 %vm3866_vm0, %v3865_v2 }
 0x600   :  { %3752 = vmatprep.subr.mxu0 %v3865_v2  ;;  %3785 = vmatprep.subr.mxu1 %v2313_v7 }
 0x601   :  { %3753 = vmatpush3.msra.mxu0 %v4966_v62  ;;  %v2303_v62 = vld [vmem:[%s5461_s7 + $0x28] sm:$0xff] }
 0x602   :  { %3754 = vmatprep.subr.mxu0 %v3865_v2 }
 0x603   :  { %3755 = vmatpush3.msra.mxu0 %v4975_v47  ;;  %v2302_v47 = vld [vmem:[%s5461_s7 + $0x20] sm:$0xff] }
 0x604   :  { %3756 = vmatprep.subr.mxu0 %v3865_v2 }
 0x605   :  { %3757 = vmatpush3.msra.mxu0 %v4984_v63  ;;  %v2301_v63 = vld [vmem:[%s5461_s7 + $0x18] sm:$0xff] }
 0x606   :  { %3758 = vmatprep.subr.mxu0 %v3865_v2 }
 0x607   :  { %3759 = vmatpush3.msra.mxu0 %v4993_v1  ;;  %v2300_v1 = vld [vmem:[%s5461_s7 + $0x10] sm:$0xff] }
 0x608   :  { %3760 = vmatprep.subr.mxu0 %v3865_v2 }
 0x609   :  { %3761 = vmatpush3.msra.mxu0 %v5002_v44  ;;  %v2299_v44 = vld [vmem:[%s5461_s7 + $0x8] sm:$0xff] }
 0x60a   :  { %3762 = vmatprep.subr.mxu0 %v3865_v2 }
 0x60b   :  { %3763 = vmatpush3.msra.mxu0 %v5011_v46  ;;  %v2298_v46 = vld [vmem:[%s5461_s7] sm:$0xff] }
 0x60c   :  { %3764 = vmatprep.subr.mxu0 %v3865_v2 }
 0x60d   :  { %3765 = vmatpush3.msra.mxu0 %v5020_v48 }
 0x60e   :  { %3766 = vmatprep.subr.mxu0 %v3865_v2 }
 0x60f   :  { %3767 = vmatpush3.msra.mxu0 %v5030_v52 }
 0x610   :  { %3768 = vmatprep.subr.mxu0 %v3865_v2 }
 0x611   :  { %3769 = vmatpush3.msra.mxu0 %v5039_v3 }
 0x612   :  { %3770 = vmatprep.subr.mxu0 %v3865_v2 }
 0x613   :  { %3771 = vmatpush3.msra.mxu0 %v5048_v59  ;;  %v2444_v59 = vld [vmem:[%s5463_s8] ss:$0 sm:$0xff] }
 0x614   :  { %3772 = vmatprep.subr.mxu0 %v3865_v2 }
 0x615   :  { %3773 = vmatpush3.msra.mxu0 %v5057_v0 }
 0x616   :  { %3774 = vmatprep.subr.mxu0 %v3865_v2 }
 0x617   :  { %3775 = vmatpush3.msra.mxu0 %v5066_v5 }
 0x618   :  { %3776 = vmatprep.subr.mxu0 %v3865_v2 }
 0x619   :  { %3777 = vmatpush3.msra.mxu0 %v5075_v14 }
 0x61a   :  { %3778 = vmatprep.subr.mxu0 %v3865_v2 }
 0x61b   :  { %3779 = vmatpush3.msra.mxu0 %v5084_v16 }
 0x61c   :  { %3780 = vmatprep.subr.mxu0 %v3865_v2  ;;  %v2312_v2 = vld [vmem:[%s5461_s7 + $0x70] sm:$0xff] }
 0x61d   :  { %3781 = vmatpush3.msra.mxu0 %v5093_v18 }
 0x69d   :  { %v1932_v13 = vpop.f32.mrf.mxu0  ;;  %v2020_v15 = vpop.f32.mrf.mxu1 }
 0x69e   :  { %v1936_v17 = vadd.f32 %v1932_v13, %v167_v11  ;;  %v2021_v34 = vadd.f32 %v5176_v45, %v2020_v15 }
 0x69f   :  { %v3644_v19 = vpop.f32.mrf.mxu0  ;;  %v3679_v21 = vpop.f32.mrf.mxu1 }
 0x6a0   :  { %3857 = vtanh.f32 %v1936_v17 }
 0x6ad   :  { %v3858_v23 = vpop.eup %3857 }
 0x6ae   :  { %2288 = vst [vmem:[%s5462_s10] sm:$0xff] %v3858_v23  ;;  %3748 = vmatmul.mubr.f32.vlgmr.msra.gmra.mxu1 %v3858_v23 }
 0x6af   :  { %3786 = vmatpush3.msra.mxu1 %v2313_v7  ;;  %3817 = vmatprep.mubr.f32.mxu1 %v4531_v12  ;;  %v2308_v12 = vld [vmem:[%s5461_s7 + $0x50] sm:$0xff] }
 0x6b0   :  { %3787 = vmatprep.subr.mxu1 %v2312_v2 }
 0x6b1   :  { %3788 = vmatpush3.msra.mxu1 %v2312_v2 }
 0x6b2   :  { %3789 = vmatprep.subr.mxu1 %v2311_v49 }
 0x6b3   :  { %3790 = vmatpush3.msra.mxu1 %v2311_v49 }
 0x6b4   :  { %3791 = vmatprep.subr.mxu1 %v2310_v25 }
 0x6b5   :  { %3792 = vmatpush3.msra.mxu1 %v2310_v25 }
 0x6b6   :  { %3793 = vmatprep.subr.mxu1 %v2309_v27 }
 0x6b7   :  { %3794 = vmatpush3.msra.mxu1 %v2309_v27 }
 0x6b8   :  { %3795 = vmatprep.subr.mxu1 %v2308_v12 }
 0x6b9   :  { %3796 = vmatpush3.msra.mxu1 %v2308_v12 }
 0x6ba   :  { %3797 = vmatprep.subr.mxu1 %v2307_v29 }
 0x6bb   :  { %3798 = vmatpush3.msra.mxu1 %v2307_v29 }
 0x6bc   :  { %3799 = vmatprep.subr.mxu1 %v2306_v30 }
 0x6bd   :  { %v2106_v6 = vpop.f32.mrf.mxu0  ;;  %3800 = vmatpush3.msra.mxu1 %v2306_v30 }
 0x6be   :  { %v2110_v10 = vadd.f32 %v2106_v6, %v2021_v34  ;;  %3801 = vmatprep.subr.mxu1 %v2305_v32 }
 0x6bf   :  { %v3714_v26 = vpop.f32.mrf.mxu0  ;;  %3802 = vmatpush3.msra.mxu1 %v2305_v32 }
 0x6c0   :  { %3859 = vtanh.f32 %v2110_v10  ;;  %3803 = vmatprep.subr.mxu1 %v2304_v8 }
 0x6c1   :  { %3804 = vmatpush3.msra.mxu1 %v2304_v8 }
 0x6c2   :  { %3805 = vmatprep.subr.mxu1 %v2303_v62 }
 0x6c3   :  { %3806 = vmatpush3.msra.mxu1 %v2303_v62 }
 0x6c4   :  { %3807 = vmatprep.subr.mxu1 %v2302_v47 }
 0x6c5   :  { %3808 = vmatpush3.msra.mxu1 %v2302_v47 }
 0x6c6   :  { %3809 = vmatprep.subr.mxu1 %v2301_v63 }
 0x6c7   :  { %3810 = vmatpush3.msra.mxu1 %v2301_v63 }
 0x6c8   :  { %3811 = vmatprep.subr.mxu1 %v2300_v1 }
 0x6c9   :  { %3812 = vmatpush3.msra.mxu1 %v2300_v1 }
 0x6ca   :  { %3813 = vmatprep.subr.mxu1 %v2299_v44 }
 0x6cb   :  { %3814 = vmatpush3.msra.mxu1 %v2299_v44 }
 0x6cc   :  { %3815 = vmatprep.subr.mxu1 %v2298_v46 }
 0x6cd   :  { %v3860_v48 = vpop.eup %3859  ;;  %3816 = vmatpush3.msra.mxu1 %v2298_v46 }
 0x6ce   :  { %3783 = vmatmul.mubr.f32.vlgmr.msra.gmra.mxu0 %v3860_v48  ;;  %3818 = vmatmul.mubr.f32.vlgmr.msra.gmra.mxu1 %v4668_v4 }
 0x6cf   :  { %3820 = vmatprep.mubr.f32.mxu1 %v4832_v9 }
 0x6d2   :  { %3821 = vmatmul.mubr.f32.gmra.mxu1 %v5100_v20 }
 0x6d3   :  { %3823 = vmatprep.mubr.f32.mxu1 %v5213_v43 }
 0x6d6   :  { %3824 = vmatmul.mubr.f32.gmra.mxu1 %v5321_v42 }
 0x6d7   :  { %3826 = vmatprep.mubr.f32.mxu1 %v3860_v48 }
 0x76e   :  { %v2195_v52 = vpop.f32.mrf.mxu1 }
 0x76f   :  { %v2196_v0 = vadd.f32 %v5176_v45, %v2195_v52 }
 0x770   :  { %v3749_v3 = vpop.f32.mrf.mxu1 }
 0x78e   :  { %v2281_v5 = vpop.f32.mrf.mxu0  ;;  %v3819_v14 = vpop.f32.mrf.mxu1 }
 0x78f   :  { %v2285_v4 = vadd.f32 %v2281_v5, %v2196_v0  ;;  %v2393_v16 = vadd.f32 %v3819_v14, %v2444_v59 }
 0x790   :  { %v3784_v9 = vpop.f32.mrf.mxu0  ;;  %v2387_v18 = vpop.f32.mrf.mxu1 }
 0x791   :  { %3861 = vtanh.f32 %v2285_v4  ;;  %2427 = vst [vmem:[%s5464_s9 + $0x8] sm:$0xff] %v2393_v16  ;;  %v2388_v20 = vadd.f32 %v2444_v59, %v2387_v18 }
 0x792   :  { %v3822_v22 = vpop.f32.mrf.mxu1 }
 0x793   :  { %2426 = vst [vmem:[%s5464_s9] sm:$0xff] %v2388_v20  ;;  %v2403_v24 = vadd.f32 %v3822_v22, %v2444_v59 }
 0x794   :  { %v2397_v61 = vpop.f32.mrf.mxu1 }
 0x795   :  { %2429 = vst [vmem:[%s5464_s9 + $0x18] sm:$0xff] %v2403_v24  ;;  %v2398_v50 = vadd.f32 %v2444_v59, %v2397_v61 }
 0x796   :  { %v3825_v54 = vpop.f32.mrf.mxu1 }
 0x797   :  { %2428 = vst [vmem:[%s5464_s9 + $0x10] sm:$0xff] %v2398_v50  ;;  %v2413_v55 = vadd.f32 %v3825_v54, %v2444_v59 }
 0x798   :  { %v2407_v56 = vpop.f32.mrf.mxu1 }
 0x799   :  { %2431 = vst [vmem:[%s5464_s9 + $0x28] sm:$0xff] %v2413_v55  ;;  %v2408_v45 = vadd.f32 %v2444_v59, %v2407_v56 }
 0x79b   :  { %2430 = vst [vmem:[%s5464_s9 + $0x20] sm:$0xff] %v2408_v45 }
 0x79e   :  { %v3862_v28 = vpop.eup %3861 }
 0x79f   :  { %2289 = vst [vmem:[%s5462_s10 + $0x8] sm:$0xff] %v3862_v28  ;;  %3827 = vmatmul.mubr.f32.gmra.mxu1 %v3862_v28 }
 0x85f   :  { %v3828_v31 = vpop.f32.mrf.mxu1 }
 0x860   :  { %v2423_v33 = vadd.f32 %v3828_v31, %v2444_v59 }
 0x861   :  { %v2417_v57 = vpop.f32.mrf.mxu1 }
 0x862   :  { %2433 = vst [vmem:[%s5464_s9 + $0x38] sm:$0xff] %v2423_v33  ;;  %v2418_v43 = vadd.f32 %v2444_v59, %v2417_v57 }
 0x864   :  { %2432 = vst [vmem:[%s5464_s9 + $0x30] sm:$0xff] %v2418_v43 }

</bundles_post_ra>
